<compile_context>
chip_gen: v7x
topology: tpu7x:2x2x1
jax: 0.10.0
libtpu: 0.0.40
codegen_flags: <defaults>
</compile_context>

<pallas_src>
import math
import functools

import jax
import jax.numpy as jnp
from jax.experimental import pallas as pl
from jax.experimental.pallas import tpu as pltpu

EPS = 1e-5  # nn.LayerNorm default eps


class Config:
    d_model = 32
    head_num = 4
    k_dim = 8          # head_num * k_dim == d_model here
    d_ff = 64
    p_drop = 0.1       # dropout -> identity (eval)
    num_layer = 2
    max_len = 16


EMBEDDING_NUM = 50


# ----------------------------- fused Pallas kernel -----------------------------

def _block_mask(R, rg, C, cg):
    """(R, C) f32 mask: 1.0 where row-group (row//rg) == col-group (col//cg)."""
    ri = jax.lax.broadcasted_iota(jnp.int32, (R, C), 0)
    ci = jax.lax.broadcasted_iota(jnp.int32, (R, C), 1)
    if (rg & (rg - 1)) == 0 and (cg & (cg - 1)) == 0:
        rid = (ri - (ri & (rg - 1))) * cg     # (row // rg) * rg * cg, no vector div
        cid = (ci - (ci & (cg - 1))) * rg     # (col // cg) * cg * rg
    else:
        # TODO(synk): vector integer-division path (unused at these power-of-two shapes)
        rid = (ri // rg) * rg * cg
        cid = (ci // cg) * cg * rg
    return jnp.where(rid == cid, jnp.float32(1.0), jnp.float32(0.0))


def _decoder_kernel(ids_ref, enc_ref, tmask_ref, smask_ref, emb_pos_ref,
                    wqkv_s_ref, wq_d_ref, wkv_d_ref, ln_ref, w1_ref, w2_ref,
                    tr_ref, o_ref, *, B, T, Ts, D, H, kd, dff, L, E_rows):
    f32 = jnp.float32
    Dqk = H * kd
    dv = D // H

    # ---------- hoisted constants: block-diagonal head masks ----------
    hm_k_t = _block_mask(H * T, T, Dqk, kd)     # K expansion mask (self-attn)
    hm_v_t = _block_mask(H * T, T, D, dv)       # V expansion mask (self-attn)
    gsum_t = _block_mask(H * T, T, H * T, T)    # per-head group-sum matrix
    if Ts == T:
        hm_k_s, hm_v_s, gsum_s = hm_k_t, hm_v_t, gsum_t
    else:
        hm_k_s = _block_mask(H * Ts, Ts, Dqk, kd)
        hm_v_s = _block_mask(H * Ts, Ts, D, dv)
        gsum_s = _block_mask(H * Ts, Ts, H * Ts, Ts)

    # ---------- hoisted attention masks: head-tiled, query-broadcast ----------
    tmask_big = jnp.concatenate([tmask_ref[...]] * H, axis=-1) > 0.5          # (B,T,H*T)
    smask_big = jnp.broadcast_to(
        jnp.concatenate([smask_ref[...]] * H, axis=-1), (B, T, H * Ts)) > 0.5  # (B,T,H*Ts)

    # ---------- embedding gather (SMEM ids -> dynamic VMEM row loads) ----------
    rows = []
    for b in range(B):
        for t in range(T):
            rows.append(emb_pos_ref[pl.ds(ids_ref[b, t], 1), :])
    x = jnp.concatenate(rows, axis=0)                                          # (B*T, D)
    # Position_Encoding(eye(T, max_len)) == pos_w[:T] + pos_b (precomputed rows).
    pos = emb_pos_ref[E_rows:E_rows + T, :]                                    # (T, D)
    x = x + jnp.concatenate([pos] * B, axis=0)
    # dropout: identity (eval)

    # ---------- dec-enc K/V projection: hoisted & fused across all layers ----------
    enc2 = enc_ref[...].reshape(B * Ts, D)
    kvw = wkv_d_ref[...]
    kv_all = jnp.dot(enc2, kvw[:D, :], preferred_element_type=f32) + kvw[D:D + 1, :]

    def layer_norm(s, g, beta):
        mu = jnp.mean(s, axis=-1, keepdims=True)
        var = jnp.mean((s - mu) ** 2, axis=-1, keepdims=True)
        return (s - mu) * jax.lax.rsqrt(var + EPS) * g + beta

    def attend(q3, k3, v3, mask_big, hm_k, hm_v, gsum, Tq, Tk):
        # Block-diagonal multi-head attention: replicate K/V per head row-group
        # and zero the other heads' lanes, so ONE batched contraction produces
        # every head's scores side-by-side in lane groups of Tk.
        kbig = jnp.concatenate([k3] * H, axis=1) * hm_k                        # (B,H*Tk,Dqk)
        vbig = jnp.concatenate([v3] * H, axis=1) * hm_v                        # (B,H*Tk,D)
        s = jnp.einsum('bqd,bkd->bqk', q3, kbig, preferred_element_type=f32)
        # masked_fill(mask, 1e-10) quirk of the reference (NOT -inf) — keep it.
        s = jnp.where(mask_big, jnp.float32(1e-10), s)
        s = s - jnp.max(s, axis=-1, keepdims=True)   # per-row shift, softmax-invariant
        e = jnp.exp(s).reshape(B * Tq, H * Tk)
        denom = jnp.dot(e, gsum, preferred_element_type=f32)                   # per-head sums
        p = (e * pl.reciprocal(denom, approx=True)).reshape(B, Tq, H * Tk)
        o = jnp.einsum('bqm,bmd->bqd', p, vbig, preferred_element_type=f32)
        return o.reshape(B * Tq, D)   # heads land in their natural lane groups

    kv_stride = Dqk + D
    for l in range(L):                                   # static unroll, L == 2
        lnp = ln_ref[l]                                  # (6, D)

        # ---- masked self-attention: one fused QKV matmul (Q pre-scaled) ----
        wb = wqkv_s_ref[l]                               # (D+1, 2*Dqk+D), last row = bias
        qkv = jnp.dot(x, wb[:D, :], preferred_element_type=f32) + wb[D:D + 1, :]
        qkv3 = qkv.reshape(B, T, 2 * Dqk + D)
        attn = attend(qkv3[:, :, :Dqk], qkv3[:, :, Dqk:2 * Dqk],
                      qkv3[:, :, 2 * Dqk:], tmask_big,
                      hm_k_t, hm_v_t, gsum_t, T, T)
        x = layer_norm(x + attn, lnp[0:1, :], lnp[1:2, :])

        # ---- decoder-encoder attention (K/V precomputed above) ----
        wq = wq_d_ref[l]                                 # (D+1, Dqk)
        q = jnp.dot(x, wq[:D, :], preferred_element_type=f32) + wq[D:D + 1, :]
        k3 = kv_all[:, l * kv_stride:l * kv_stride + Dqk].reshape(B, Ts, Dqk)
        v3 = kv_all[:, l * kv_stride + Dqk:(l + 1) * kv_stride].reshape(B, Ts, D)
        attn = attend(q.reshape(B, T, Dqk), k3, v3, smask_big,
                      hm_k_s, hm_v_s, gsum_s, T, Ts)
        x = layer_norm(x + attn, lnp[2:3, :], lnp[3:4, :])

        # ---- position-wise FFN ----
        w1 = w1_ref[l]                                   # (D+1, dff)
        w2 = w2_ref[l]                                   # (dff+1, D)
        h = jnp.maximum(jnp.dot(x, w1[:D, :], preferred_element_type=f32)
                        + w1[D:D + 1, :], 0.0)
        f = jnp.dot(h, w2[:dff, :], preferred_element_type=f32) + w2[dff:dff + 1, :]
        x = layer_norm(f + x, lnp[4:5, :], lnp[5:6, :])

    # ---- final vocab projection (lane-padded output, unmasked stores) ----
    tw = tr_ref[...]                                     # (D+1, Epad)
    o_ref[...] = jnp.dot(x, tw[:D, :], preferred_element_type=f32) + tw[D:D + 1, :]


# ----------------------------- weight preparation -----------------------------

def prepare_params(params, cfg, embedding_num):
    """Fold double projections, fold the 1/sqrt(kd) scale into Q, pack biases as
    an extra weight row, fuse dec-enc K/V weights across layers, pack LN params,
    and pad the embedding table / vocab projection for dense layouts."""
    D = cfg.d_model
    scale = 1.0 / math.sqrt(cfg.k_dim)

    def fold(mp, a, b):
        w = mp[a + "_w"] @ mp[b + "_w"]
        bb = mp[a + "_b"] @ mp[b + "_w"] + mp[b + "_b"]
        return w, bb

    wqkv_s, wq_d, wkv_w_cols, wkv_b_cols = [], [], [], []
    ln_l, w1_l, w2_l = [], [], []
    for lp in params["layers"]:
        m = lp["mmh"]
        wq, bq = fold(m, "q", "qm")
        wk, bk = fold(m, "k", "km")
        wv, bv = fold(m, "v", "vm")
        w = jnp.concatenate([wq * scale, wk, wv], axis=1)
        b = jnp.concatenate([bq * scale, bk, bv])[None, :]
        wqkv_s.append(jnp.concatenate([w, b], axis=0))            # (D+1, 2Dqk+D)

        d = lp["dea"]
        wq, bq = fold(d, "q", "qm")
        wk, bk = fold(d, "k", "km")
        wv, bv = fold(d, "v", "vm")
        wq_d.append(jnp.concatenate([wq * scale, (bq * scale)[None, :]], axis=0))
        wkv_w_cols.append(jnp.concatenate([wk, wv], axis=1))      # (D, Dqk+D)
        wkv_b_cols.append(jnp.concatenate([bk, bv]))              # (Dqk+D,)

        ln_l.append(jnp.stack([lp["ln1_g"], lp["ln1_b"], lp["ln2_g"], lp["ln2_b"],
                               lp["ln3_g"], lp["ln3_b"]], axis=0))  # (6, D)
        w1_l.append(jnp.concatenate([lp["fc1_w"], lp["fc1_b"][None, :]], axis=0))
        w2_l.append(jnp.concatenate([lp["fc2_w"], lp["fc2_b"][None, :]], axis=0))

    wkv_d = jnp.concatenate(
        [jnp.concatenate(wkv_w_cols, axis=1),
         jnp.concatenate(wkv_b_cols)[None, :]], axis=0)           # (D+1, L*(Dqk+D))

    E = embedding_num
    e_rows = ((E + 7) // 8) * 8
    emb_pad = jnp.zeros((e_rows, D), jnp.float32).at[:E].set(params["embedding"])
    pos_full = params["pos_w"] + params["pos_b"][None, :]         # (max_len, D)
    emb_pos = jnp.concatenate([emb_pad, pos_full], axis=0)        # (e_rows + max_len, D)

    epad = ((E + 127) // 128) * 128                               # lane-dense output
    trw = jnp.zeros((D, epad), jnp.float32).at[:, :E].set(params["tr_w"])
    trb = jnp.zeros((1, epad), jnp.float32).at[0, :E].set(params["tr_b"])

    return dict(
        emb_pos=emb_pos,
        wqkv_s=jnp.stack(wqkv_s),
        wq_d=jnp.stack(wq_d),
        wkv_d=wkv_d,
        ln=jnp.stack(ln_l),
        w1=jnp.stack(w1_l),
        w2=jnp.stack(w2_l),
        tr=jnp.concatenate([trw, trb], axis=0),
    )


# ----------------------------- forward (single pallas_call) -----------------------------

def decoder_forward(prepared, encoder_output, trg_ids, trg_mask, src_mask, *,
                    cfg, embedding_num):
    B, T = trg_ids.shape
    Ts = encoder_output.shape[1]
    D = cfg.d_model
    E = embedding_num
    e_rows = ((E + 7) // 8) * 8
    epad = prepared["tr"].shape[1]

    # Compact masks (1.0 == masked); head tiling / query broadcast happen in-kernel.
    tmask = trg_mask[:, 0].astype(jnp.float32)        # (B, T, T)
    smask = src_mask.astype(jnp.float32)              # (B, 1, Ts)

    kernel = functools.partial(
        _decoder_kernel, B=B, T=T, Ts=Ts, D=D, H=cfg.head_num, kd=cfg.k_dim,
        dff=cfg.d_ff, L=cfg.num_layer, E_rows=e_rows)

    vmem = pl.BlockSpec(memory_space=pltpu.MemorySpace.VMEM)
    smem = pl.BlockSpec(memory_space=pltpu.MemorySpace.SMEM)

    out = pl.pallas_call(
        kernel,
        out_shape=jax.ShapeDtypeStruct((B * T, epad), jnp.float32),
        in_specs=[smem,                       # trg ids (scalars driving the row gather)
                  vmem, vmem, vmem,           # enc, tmask, smask
                  vmem, vmem, vmem, vmem,     # emb+pos, self QKV, dec-enc Q, dec-enc KV
                  vmem, vmem, vmem, vmem],    # layer-norms, fc1, fc2, vocab projection
        out_specs=vmem,
        # footprint is ~250 KB; default scoped-VMEM limit is ample on v5e/v6e/v7x
    )(trg_ids.astype(jnp.int32), encoder_output.astype(jnp.float32), tmask, smask,
      prepared["emb_pos"], prepared["wqkv_s"], prepared["wq_d"], prepared["wkv_d"],
      prepared["ln"], prepared["w1"], prepared["w2"], prepared["tr"])

    return out[:, :E].reshape(B, T, E)


# ----------------------------- pure-JAX reference -----------------------------

def _ref_ln(x, g, b):
    mu = x.mean(-1, keepdims=True)
    var = ((x - mu) ** 2).mean(-1, keepdims=True)
    return (x - mu) / jnp.sqrt(var + EPS) * g + b


def _ref_mha(p, x, y, mask_bool, cfg):
    B, Tq, d = x.shape
    Tk = y.shape[1]
    H, kd = cfg.head_num, cfg.k_dim
    dv = d // H
    q = x @ p["q_w"] + p["q_b"]
    k = y @ p["k_w"] + p["k_b"]
    v = y @ p["v_w"] + p["v_b"]
    q = (q @ p["qm_w"] + p["qm_b"]).reshape(B, Tq, H, kd).transpose(0, 2, 1, 3)
    k = (k @ p["km_w"] + p["km_b"]).reshape(B, Tk, H, kd).transpose(0, 2, 1, 3)
    v = (v @ p["vm_w"] + p["vm_b"]).reshape(B, Tk, H, dv).transpose(0, 2, 1, 3)
    s = jnp.einsum("bhqd,bhkd->bhqk", q, k) / math.sqrt(kd)
    s = jnp.where(jnp.broadcast_to(mask_bool, s.shape), 1e-10, s)
    a = jax.nn.softmax(s, axis=-1)
    o = jnp.einsum("bhqk,bhkd->bhqd", a, v).transpose(0, 2, 1, 3)
    return o.reshape(B, Tq, d)


def ref_decoder(params, cfg, enc_out, trg_ids, trg_mask, src_mask):
    emb = params["embedding"][trg_ids]
    T = trg_ids.shape[1]
    pos = jnp.eye(T, cfg.max_len, dtype=jnp.float32)
    position = pos @ params["pos_w"] + params["pos_b"]
    x = emb + position[None]
    src_mask_u = src_mask[:, None]
    for lp in params["layers"]:
        t = _ref_mha(lp["mmh"], x, x, trg_mask, cfg)
        x = _ref_ln(x + t, lp["ln1_g"], lp["ln1_b"])
        t = _ref_mha(lp["dea"], x, enc_out, src_mask_u, cfg)
        x = _ref_ln(x + t, lp["ln2_g"], lp["ln2_b"])
        h = jnp.maximum(x @ lp["fc1_w"] + lp["fc1_b"], 0.0)
        t = h @ lp["fc2_w"] + lp["fc2_b"]
        x = _ref_ln(t + x, lp["ln3_g"], lp["ln3_b"])
    return x @ params["tr_w"] + params["tr_b"]


# ----------------------------- parameter init -----------------------------

def init_params(key, cfg, embedding_num):
    keys = iter(jax.random.split(key, 256))

    def lin(d_in, d_out):
        k1, k2 = jax.random.split(next(keys))
        bound = 1.0 / math.sqrt(d_in)
        w = jax.random.uniform(k1, (d_in, d_out), jnp.float32, -bound, bound)
        b = jax.random.uniform(k2, (d_out,), jnp.float32, -bound, bound)
        return w, b

    params = {}
    params["embedding"] = jax.random.normal(
        next(keys), (embedding_num, cfg.d_model), jnp.float32)
    params["pos_w"], params["pos_b"] = lin(cfg.max_len, cfg.d_model)

    layers = []
    for _ in range(cfg.num_layer):
        lp = {}
        for name in ("mmh", "dea"):
            mp = {}
            mp["q_w"], mp["q_b"] = lin(cfg.d_model, cfg.d_model)
            mp["k_w"], mp["k_b"] = lin(cfg.d_model, cfg.d_model)
            mp["v_w"], mp["v_b"] = lin(cfg.d_model, cfg.d_model)
            mp["qm_w"], mp["qm_b"] = lin(cfg.d_model, cfg.head_num * cfg.k_dim)
            mp["km_w"], mp["km_b"] = lin(cfg.d_model, cfg.head_num * cfg.k_dim)
            mp["vm_w"], mp["vm_b"] = lin(cfg.d_model, cfg.d_model)
            lp[name] = mp
        for i in (1, 2, 3):
            lp[f"ln{i}_g"] = jnp.ones((cfg.d_model,), jnp.float32)
            lp[f"ln{i}_b"] = jnp.zeros((cfg.d_model,), jnp.float32)
        lp["fc1_w"], lp["fc1_b"] = lin(cfg.d_model, cfg.d_ff)
        lp["fc2_w"], lp["fc2_b"] = lin(cfg.d_ff, cfg.d_model)
        layers.append(lp)
    params["layers"] = layers
    params["tr_w"], params["tr_b"] = lin(cfg.d_model, embedding_num)
    return params


# ----------------------------- main -----------------------------

if __name__ == "__main__":
    cfg = Config()
    B, T_trg, T_src = 2, 8, 8

    key = jax.random.PRNGKey(0)
    kp, ke, kt = jax.random.split(key, 3)

    params = init_params(kp, cfg, EMBEDDING_NUM)
    prepared = prepare_params(params, cfg, EMBEDDING_NUM)

    encoder_output = jax.random.normal(ke, (B, T_src, cfg.d_model), jnp.float32)
    trg_ids = jax.random.randint(kt, (B, T_trg), 0, EMBEDDING_NUM)

    # causal mask for masked self-attention (True == masked)
    trg_mask = jnp.broadcast_to(
        jnp.triu(jnp.ones((T_trg, T_trg), bool), k=1)[None, None],
        (B, 1, T_trg, T_trg))
    # padding mask for encoder output: mask last 2 src positions of batch 1
    src_mask = jnp.zeros((B, 1, T_src), bool).at[1, 0, -2:].set(True)

    fwd = jax.jit(functools.partial(decoder_forward, cfg=cfg,
                                    embedding_num=EMBEDDING_NUM))
    out = fwd(prepared, encoder_output, trg_ids, trg_mask, src_mask)
    out = jax.block_until_ready(out)

    ref = ref_decoder(params, cfg, encoder_output, trg_ids, trg_mask, src_mask)

    assert out.shape == (B, T_trg, EMBEDDING_NUM), out.shape
    max_err = float(jnp.max(jnp.abs(out - ref)))
    assert jnp.allclose(out, ref, atol=2e-3, rtol=2e-3), max_err
    print("KERNEL_OK")
</pallas_src>

<mosaic_0001>
module attributes {stable_mosaic.version = 11 : i64} {
  func.func @_decoder_kernel(%arg0: memref<2x8xi32, #tpu.memory_space<smem>>, %arg1: memref<2x8x32xf32, #tpu.memory_space<vmem>>, %arg2: memref<2x8x8xf32, #tpu.memory_space<vmem>>, %arg3: memref<2x1x8xf32, #tpu.memory_space<vmem>>, %arg4: memref<72x32xf32, #tpu.memory_space<vmem>>, %arg5: memref<2x33x96xf32, #tpu.memory_space<vmem>>, %arg6: memref<2x33x32xf32, #tpu.memory_space<vmem>>, %arg7: memref<33x128xf32, #tpu.memory_space<vmem>>, %arg8: memref<2x6x32xf32, #tpu.memory_space<vmem>>, %arg9: memref<2x33x64xf32, #tpu.memory_space<vmem>>, %arg10: memref<2x65x32xf32, #tpu.memory_space<vmem>>, %arg11: memref<33x128xf32, #tpu.memory_space<vmem>>, %arg12: memref<16x128xf32, #tpu.memory_space<vmem>>) attributes {dimension_semantics = [], scalar_prefetch = 0 : i64, scratch_operands = 0 : i64, tpu.core_type = #tpu.core_type<tc>} {
    %0 = tpu.iota {dimensions = array<i32: 0>} : vector<32x32xi32>
    %1 = tpu.iota {dimensions = array<i32: 1>} : vector<32x32xi32>
    %c7_i32 = arith.constant 7 : i32
    %2 = vector.broadcast %c7_i32 : i32 to vector<32x32xi32>
    %3 = arith.andi %0, %2 : vector<32x32xi32>
    %4 = arith.subi %0, %3 : vector<32x32xi32>
    %c8_i32 = arith.constant 8 : i32
    %5 = vector.broadcast %c8_i32 : i32 to vector<32x32xi32>
    %6 = arith.muli %4, %5 : vector<32x32xi32>
    %c7_i32_0 = arith.constant 7 : i32
    %7 = vector.broadcast %c7_i32_0 : i32 to vector<32x32xi32>
    %8 = arith.andi %1, %7 : vector<32x32xi32>
    %9 = arith.subi %1, %8 : vector<32x32xi32>
    %c8_i32_1 = arith.constant 8 : i32
    %10 = vector.broadcast %c8_i32_1 : i32 to vector<32x32xi32>
    %11 = arith.muli %9, %10 : vector<32x32xi32>
    %12 = arith.cmpi eq, %6, %11 : vector<32x32xi32>
    %cst = arith.constant 1.000000e+00 : f32
    %cst_2 = arith.constant 0.000000e+00 : f32
    %13 = vector.broadcast %cst : f32 to vector<32x32xf32>
    %14 = vector.broadcast %cst_2 : f32 to vector<32x32xf32>
    %15 = arith.select %12, %13, %14 : vector<32x32xi1>, vector<32x32xf32>
    %16 = tpu.iota {dimensions = array<i32: 0>} : vector<32x32xi32>
    %17 = tpu.iota {dimensions = array<i32: 1>} : vector<32x32xi32>
    %c7_i32_3 = arith.constant 7 : i32
    %18 = vector.broadcast %c7_i32_3 : i32 to vector<32x32xi32>
    %19 = arith.andi %16, %18 : vector<32x32xi32>
    %20 = arith.subi %16, %19 : vector<32x32xi32>
    %c8_i32_4 = arith.constant 8 : i32
    %21 = vector.broadcast %c8_i32_4 : i32 to vector<32x32xi32>
    %22 = arith.muli %20, %21 : vector<32x32xi32>
    %c7_i32_5 = arith.constant 7 : i32
    %23 = vector.broadcast %c7_i32_5 : i32 to vector<32x32xi32>
    %24 = arith.andi %17, %23 : vector<32x32xi32>
    %25 = arith.subi %17, %24 : vector<32x32xi32>
    %c8_i32_6 = arith.constant 8 : i32
    %26 = vector.broadcast %c8_i32_6 : i32 to vector<32x32xi32>
    %27 = arith.muli %25, %26 : vector<32x32xi32>
    %28 = arith.cmpi eq, %22, %27 : vector<32x32xi32>
    %cst_7 = arith.constant 1.000000e+00 : f32
    %cst_8 = arith.constant 0.000000e+00 : f32
    %29 = vector.broadcast %cst_7 : f32 to vector<32x32xf32>
    %30 = vector.broadcast %cst_8 : f32 to vector<32x32xf32>
    %31 = arith.select %28, %29, %30 : vector<32x32xi1>, vector<32x32xf32>
    %32 = tpu.iota {dimensions = array<i32: 0>} : vector<32x32xi32>
    %33 = tpu.iota {dimensions = array<i32: 1>} : vector<32x32xi32>
    %c7_i32_9 = arith.constant 7 : i32
    %34 = vector.broadcast %c7_i32_9 : i32 to vector<32x32xi32>
    %35 = arith.andi %32, %34 : vector<32x32xi32>
    %36 = arith.subi %32, %35 : vector<32x32xi32>
    %c8_i32_10 = arith.constant 8 : i32
    %37 = vector.broadcast %c8_i32_10 : i32 to vector<32x32xi32>
    %38 = arith.muli %36, %37 : vector<32x32xi32>
    %c7_i32_11 = arith.constant 7 : i32
    %39 = vector.broadcast %c7_i32_11 : i32 to vector<32x32xi32>
    %40 = arith.andi %33, %39 : vector<32x32xi32>
    %41 = arith.subi %33, %40 : vector<32x32xi32>
    %c8_i32_12 = arith.constant 8 : i32
    %42 = vector.broadcast %c8_i32_12 : i32 to vector<32x32xi32>
    %43 = arith.muli %41, %42 : vector<32x32xi32>
    %44 = arith.cmpi eq, %38, %43 : vector<32x32xi32>
    %cst_13 = arith.constant 1.000000e+00 : f32
    %cst_14 = arith.constant 0.000000e+00 : f32
    %45 = vector.broadcast %cst_13 : f32 to vector<32x32xf32>
    %46 = vector.broadcast %cst_14 : f32 to vector<32x32xf32>
    %47 = arith.select %44, %45, %46 : vector<32x32xi1>, vector<32x32xf32>
    %c0 = arith.constant 0 : index
    %c0_15 = arith.constant 0 : index
    %c0_16 = arith.constant 0 : index
    %48 = vector.load %arg2[%c0, %c0_15, %c0_16] : memref<2x8x8xf32, #tpu.memory_space<vmem>>, vector<2x8x8xf32>
    %49 = tpu.concatenate %48, %48, %48, %48 in 2 : vector<2x8x8xf32>, vector<2x8x8xf32>, vector<2x8x8xf32>, vector<2x8x8xf32> -> vector<2x8x32xf32>
    %cst_17 = arith.constant 5.000000e-01 : f32
    %50 = vector.broadcast %cst_17 : f32 to vector<2x8x32xf32>
    %51 = arith.cmpf ogt, %49, %50 : vector<2x8x32xf32>
    %c0_18 = arith.constant 0 : index
    %c0_19 = arith.constant 0 : index
    %c0_20 = arith.constant 0 : index
    %52 = vector.load %arg3[%c0_18, %c0_19, %c0_20] : memref<2x1x8xf32, #tpu.memory_space<vmem>>, vector<2x1x8xf32>
    %53 = tpu.concatenate %52, %52, %52, %52 in 2 : vector<2x1x8xf32>, vector<2x1x8xf32>, vector<2x1x8xf32>, vector<2x1x8xf32> -> vector<2x1x32xf32>
    %54 = vector.shape_cast %53 : vector<2x1x32xf32> to vector<2x1x32xf32>
    %55 = vector.broadcast %54 : vector<2x1x32xf32> to vector<2x8x32xf32>
    %cst_21 = arith.constant 5.000000e-01 : f32
    %56 = vector.broadcast %cst_21 : f32 to vector<2x8x32xf32>
    %57 = arith.cmpf ogt, %55, %56 : vector<2x8x32xf32>
    %c0_22 = arith.constant 0 : index
    %c0_23 = arith.constant 0 : index
    %58 = memref.load %arg0[%c0_22, %c0_23] : memref<2x8xi32, #tpu.memory_space<smem>>
    %59 = arith.index_cast %58 : i32 to index
    %c0_24 = arith.constant 0 : index
    %60 = vector.load %arg4[%59, %c0_24] : memref<72x32xf32, #tpu.memory_space<vmem>>, vector<1x32xf32>
    %c0_25 = arith.constant 0 : index
    %c1 = arith.constant 1 : index
    %61 = memref.load %arg0[%c0_25, %c1] : memref<2x8xi32, #tpu.memory_space<smem>>
    %62 = arith.index_cast %61 : i32 to index
    %c0_26 = arith.constant 0 : index
    %63 = vector.load %arg4[%62, %c0_26] : memref<72x32xf32, #tpu.memory_space<vmem>>, vector<1x32xf32>
    %c0_27 = arith.constant 0 : index
    %c2 = arith.constant 2 : index
    %64 = memref.load %arg0[%c0_27, %c2] : memref<2x8xi32, #tpu.memory_space<smem>>
    %65 = arith.index_cast %64 : i32 to index
    %c0_28 = arith.constant 0 : index
    %66 = vector.load %arg4[%65, %c0_28] : memref<72x32xf32, #tpu.memory_space<vmem>>, vector<1x32xf32>
    %c0_29 = arith.constant 0 : index
    %c3 = arith.constant 3 : index
    %67 = memref.load %arg0[%c0_29, %c3] : memref<2x8xi32, #tpu.memory_space<smem>>
    %68 = arith.index_cast %67 : i32 to index
    %c0_30 = arith.constant 0 : index
    %69 = vector.load %arg4[%68, %c0_30] : memref<72x32xf32, #tpu.memory_space<vmem>>, vector<1x32xf32>
    %c0_31 = arith.constant 0 : index
    %c4 = arith.constant 4 : index
    %70 = memref.load %arg0[%c0_31, %c4] : memref<2x8xi32, #tpu.memory_space<smem>>
    %71 = arith.index_cast %70 : i32 to index
    %c0_32 = arith.constant 0 : index
    %72 = vector.load %arg4[%71, %c0_32] : memref<72x32xf32, #tpu.memory_space<vmem>>, vector<1x32xf32>
    %c0_33 = arith.constant 0 : index
    %c5 = arith.constant 5 : index
    %73 = memref.load %arg0[%c0_33, %c5] : memref<2x8xi32, #tpu.memory_space<smem>>
    %74 = arith.index_cast %73 : i32 to index
    %c0_34 = arith.constant 0 : index
    %75 = vector.load %arg4[%74, %c0_34] : memref<72x32xf32, #tpu.memory_space<vmem>>, vector<1x32xf32>
    %c0_35 = arith.constant 0 : index
    %c6 = arith.constant 6 : index
    %76 = memref.load %arg0[%c0_35, %c6] : memref<2x8xi32, #tpu.memory_space<smem>>
    %77 = arith.index_cast %76 : i32 to index
    %c0_36 = arith.constant 0 : index
    %78 = vector.load %arg4[%77, %c0_36] : memref<72x32xf32, #tpu.memory_space<vmem>>, vector<1x32xf32>
    %c0_37 = arith.constant 0 : index
    %c7 = arith.constant 7 : index
    %79 = memref.load %arg0[%c0_37, %c7] : memref<2x8xi32, #tpu.memory_space<smem>>
    %80 = arith.index_cast %79 : i32 to index
    %c0_38 = arith.constant 0 : index
    %81 = vector.load %arg4[%80, %c0_38] : memref<72x32xf32, #tpu.memory_space<vmem>>, vector<1x32xf32>
    %c1_39 = arith.constant 1 : index
    %c0_40 = arith.constant 0 : index
    %82 = memref.load %arg0[%c1_39, %c0_40] : memref<2x8xi32, #tpu.memory_space<smem>>
    %83 = arith.index_cast %82 : i32 to index
    %c0_41 = arith.constant 0 : index
    %84 = vector.load %arg4[%83, %c0_41] : memref<72x32xf32, #tpu.memory_space<vmem>>, vector<1x32xf32>
    %c1_42 = arith.constant 1 : index
    %c1_43 = arith.constant 1 : index
    %85 = memref.load %arg0[%c1_42, %c1_43] : memref<2x8xi32, #tpu.memory_space<smem>>
    %86 = arith.index_cast %85 : i32 to index
    %c0_44 = arith.constant 0 : index
    %87 = vector.load %arg4[%86, %c0_44] : memref<72x32xf32, #tpu.memory_space<vmem>>, vector<1x32xf32>
    %c1_45 = arith.constant 1 : index
    %c2_46 = arith.constant 2 : index
    %88 = memref.load %arg0[%c1_45, %c2_46] : memref<2x8xi32, #tpu.memory_space<smem>>
    %89 = arith.index_cast %88 : i32 to index
    %c0_47 = arith.constant 0 : index
    %90 = vector.load %arg4[%89, %c0_47] : memref<72x32xf32, #tpu.memory_space<vmem>>, vector<1x32xf32>
    %c1_48 = arith.constant 1 : index
    %c3_49 = arith.constant 3 : index
    %91 = memref.load %arg0[%c1_48, %c3_49] : memref<2x8xi32, #tpu.memory_space<smem>>
    %92 = arith.index_cast %91 : i32 to index
    %c0_50 = arith.constant 0 : index
    %93 = vector.load %arg4[%92, %c0_50] : memref<72x32xf32, #tpu.memory_space<vmem>>, vector<1x32xf32>
    %c1_51 = arith.constant 1 : index
    %c4_52 = arith.constant 4 : index
    %94 = memref.load %arg0[%c1_51, %c4_52] : memref<2x8xi32, #tpu.memory_space<smem>>
    %95 = arith.index_cast %94 : i32 to index
    %c0_53 = arith.constant 0 : index
    %96 = vector.load %arg4[%95, %c0_53] : memref<72x32xf32, #tpu.memory_space<vmem>>, vector<1x32xf32>
    %c1_54 = arith.constant 1 : index
    %c5_55 = arith.constant 5 : index
    %97 = memref.load %arg0[%c1_54, %c5_55] : memref<2x8xi32, #tpu.memory_space<smem>>
    %98 = arith.index_cast %97 : i32 to index
    %c0_56 = arith.constant 0 : index
    %99 = vector.load %arg4[%98, %c0_56] : memref<72x32xf32, #tpu.memory_space<vmem>>, vector<1x32xf32>
    %c1_57 = arith.constant 1 : index
    %c6_58 = arith.constant 6 : index
    %100 = memref.load %arg0[%c1_57, %c6_58] : memref<2x8xi32, #tpu.memory_space<smem>>
    %101 = arith.index_cast %100 : i32 to index
    %c0_59 = arith.constant 0 : index
    %102 = vector.load %arg4[%101, %c0_59] : memref<72x32xf32, #tpu.memory_space<vmem>>, vector<1x32xf32>
    %c1_60 = arith.constant 1 : index
    %c7_61 = arith.constant 7 : index
    %103 = memref.load %arg0[%c1_60, %c7_61] : memref<2x8xi32, #tpu.memory_space<smem>>
    %104 = arith.index_cast %103 : i32 to index
    %c0_62 = arith.constant 0 : index
    %105 = vector.load %arg4[%104, %c0_62] : memref<72x32xf32, #tpu.memory_space<vmem>>, vector<1x32xf32>
    %106 = tpu.concatenate %60, %63, %66, %69, %72, %75, %78, %81, %84, %87, %90, %93, %96, %99, %102, %105 in 0 : vector<1x32xf32>, vector<1x32xf32>, vector<1x32xf32>, vector<1x32xf32>, vector<1x32xf32>, vector<1x32xf32>, vector<1x32xf32>, vector<1x32xf32>, vector<1x32xf32>, vector<1x32xf32>, vector<1x32xf32>, vector<1x32xf32>, vector<1x32xf32>, vector<1x32xf32>, vector<1x32xf32>, vector<1x32xf32> -> vector<16x32xf32>
    %c56 = arith.constant 56 : index
    %c0_63 = arith.constant 0 : index
    %107 = vector.load %arg4[%c56, %c0_63] : memref<72x32xf32, #tpu.memory_space<vmem>>, vector<8x32xf32>
    %108 = tpu.concatenate %107, %107 in 0 : vector<8x32xf32>, vector<8x32xf32> -> vector<16x32xf32>
    %109 = arith.addf %106, %108 : vector<16x32xf32>
    %c0_64 = arith.constant 0 : index
    %c0_65 = arith.constant 0 : index
    %c0_66 = arith.constant 0 : index
    %110 = vector.load %arg1[%c0_64, %c0_65, %c0_66] : memref<2x8x32xf32, #tpu.memory_space<vmem>>, vector<2x8x32xf32>
    %111 = vector.shape_cast %110 : vector<2x8x32xf32> to vector<16x32xf32>
    %c0_67 = arith.constant 0 : index
    %c0_68 = arith.constant 0 : index
    %112 = vector.load %arg7[%c0_67, %c0_68] : memref<33x128xf32, #tpu.memory_space<vmem>>, vector<33x128xf32>
    %113 = vector.extract_strided_slice %112 {offsets = [0, 0], sizes = [32, 128], strides = [1, 1]} : vector<33x128xf32> to vector<32x128xf32>
    %cst_69 = arith.constant dense<0.000000e+00> : vector<16x128xf32>
    %114 = tpu.matmul %111, %113, %cst_69 {dimension_numbers = #tpu.dot_dimension_numbers<[1], [0], [0], [1], [0, 0, 1, 1], [], []>} : vector<16x32xf32>, vector<32x128xf32>, vector<16x128xf32> -> vector<16x128xf32>
    %115 = vector.extract_strided_slice %112 {offsets = [32, 0], sizes = [1, 128], strides = [1, 1]} : vector<33x128xf32> to vector<1x128xf32>
    %116 = vector.broadcast %115 : vector<1x128xf32> to vector<16x128xf32>
    %117 = arith.addf %114, %116 : vector<16x128xf32>
    %c0_70 = arith.constant 0 : index
    %c0_71 = arith.constant 0 : index
    %c0_72 = arith.constant 0 : index
    %118 = vector.load %arg8[%c0_70, %c0_71, %c0_72] : memref<2x6x32xf32, #tpu.memory_space<vmem>>, vector<1x6x32xf32>
    %119 = vector.shape_cast %118 : vector<1x6x32xf32> to vector<6x32xf32>
    %c0_73 = arith.constant 0 : index
    %c0_74 = arith.constant 0 : index
    %c0_75 = arith.constant 0 : index
    %120 = vector.load %arg5[%c0_73, %c0_74, %c0_75] : memref<2x33x96xf32, #tpu.memory_space<vmem>>, vector<1x33x96xf32>
    %121 = vector.shape_cast %120 : vector<1x33x96xf32> to vector<33x96xf32>
    %122 = vector.extract_strided_slice %121 {offsets = [0, 0], sizes = [32, 96], strides = [1, 1]} : vector<33x96xf32> to vector<32x96xf32>
    %cst_76 = arith.constant dense<0.000000e+00> : vector<16x96xf32>
    %123 = tpu.matmul %109, %122, %cst_76 {dimension_numbers = #tpu.dot_dimension_numbers<[1], [0], [0], [1], [0, 0, 1, 1], [], []>} : vector<16x32xf32>, vector<32x96xf32>, vector<16x96xf32> -> vector<16x96xf32>
    %124 = vector.extract_strided_slice %121 {offsets = [32, 0], sizes = [1, 96], strides = [1, 1]} : vector<33x96xf32> to vector<1x96xf32>
    %125 = vector.broadcast %124 : vector<1x96xf32> to vector<16x96xf32>
    %126 = arith.addf %123, %125 : vector<16x96xf32>
    %127 = vector.shape_cast %126 : vector<16x96xf32> to vector<2x8x96xf32>
    %128 = vector.extract_strided_slice %127 {offsets = [0, 0, 0], sizes = [2, 8, 32], strides = [1, 1, 1]} : vector<2x8x96xf32> to vector<2x8x32xf32>
    %129 = vector.extract_strided_slice %127 {offsets = [0, 0, 32], sizes = [2, 8, 32], strides = [1, 1, 1]} : vector<2x8x96xf32> to vector<2x8x32xf32>
    %130 = vector.extract_strided_slice %127 {offsets = [0, 0, 64], sizes = [2, 8, 32], strides = [1, 1, 1]} : vector<2x8x96xf32> to vector<2x8x32xf32>
    %131 = tpu.concatenate %129, %129, %129, %129 in 1 : vector<2x8x32xf32>, vector<2x8x32xf32>, vector<2x8x32xf32>, vector<2x8x32xf32> -> vector<2x32x32xf32>
    %132 = vector.shape_cast %15 : vector<32x32xf32> to vector<1x32x32xf32>
    %133 = vector.broadcast %132 : vector<1x32x32xf32> to vector<2x32x32xf32>
    %134 = arith.mulf %131, %133 : vector<2x32x32xf32>
    %135 = tpu.concatenate %130, %130, %130, %130 in 1 : vector<2x8x32xf32>, vector<2x8x32xf32>, vector<2x8x32xf32>, vector<2x8x32xf32> -> vector<2x32x32xf32>
    %136 = vector.shape_cast %31 : vector<32x32xf32> to vector<1x32x32xf32>
    %137 = vector.broadcast %136 : vector<1x32x32xf32> to vector<2x32x32xf32>
    %138 = arith.mulf %135, %137 : vector<2x32x32xf32>
    "tpu.trace_start"() <{level = 10 : i32, message = "bqd,bkd->bqk"}> : () -> ()
    %cst_77 = arith.constant dense<0.000000e+00> : vector<2x8x32xf32>
    %139 = tpu.matmul %128, %134, %cst_77 {dimension_numbers = #tpu.dot_dimension_numbers<[2], [2], [1], [1], [0, 0, 0, 1, 1, 1], [0], [0]>} : vector<2x8x32xf32>, vector<2x32x32xf32>, vector<2x8x32xf32> -> vector<2x8x32xf32>
    %cst_78 = arith.constant 1.000000e-10 : f32
    "tpu.trace_stop"() : () -> ()
    %140 = vector.broadcast %cst_78 : f32 to vector<2x8x32xf32>
    %141 = arith.select %51, %140, %139 : vector<2x8x32xi1>, vector<2x8x32xf32>
    %cst_79 = arith.constant dense<0xFF800000> : vector<2x8xf32>
    %142 = vector.multi_reduction <maximumf>, %141, %cst_79 [2] : vector<2x8x32xf32> to vector<2x8xf32>
    %143 = vector.shape_cast %142 : vector<2x8xf32> to vector<2x8x1xf32>
    %144 = vector.broadcast %143 : vector<2x8x1xf32> to vector<2x8x32xf32>
    %145 = arith.subf %141, %144 : vector<2x8x32xf32>
    %146 = math.exp %145 : vector<2x8x32xf32>
    %147 = vector.shape_cast %146 : vector<2x8x32xf32> to vector<16x32xf32>
    %cst_80 = arith.constant dense<0.000000e+00> : vector<16x32xf32>
    %148 = tpu.matmul %147, %47, %cst_80 {dimension_numbers = #tpu.dot_dimension_numbers<[1], [0], [0], [1], [0, 0, 1, 1], [], []>} : vector<16x32xf32>, vector<32x32xf32>, vector<16x32xf32> -> vector<16x32xf32>
    %149 = tpu.reciprocal %148 {approx = true} : vector<16x32xf32> -> vector<16x32xf32>
    %150 = arith.mulf %147, %149 : vector<16x32xf32>
    %151 = vector.shape_cast %150 : vector<16x32xf32> to vector<2x8x32xf32>
    "tpu.trace_start"() <{level = 10 : i32, message = "bqm,bmd->bqd"}> : () -> ()
    %cst_81 = arith.constant dense<0.000000e+00> : vector<2x8x32xf32>
    %152 = tpu.matmul %151, %138, %cst_81 {dimension_numbers = #tpu.dot_dimension_numbers<[2], [1], [1], [2], [0, 0, 0, 1, 1, 2], [0], [0]>} : vector<2x8x32xf32>, vector<2x32x32xf32>, vector<2x8x32xf32> -> vector<2x8x32xf32>
    "tpu.trace_stop"() : () -> ()
    %153 = vector.shape_cast %152 : vector<2x8x32xf32> to vector<16x32xf32>
    %154 = arith.addf %109, %153 : vector<16x32xf32>
    %155 = vector.extract_strided_slice %119 {offsets = [0, 0], sizes = [1, 32], strides = [1, 1]} : vector<6x32xf32> to vector<1x32xf32>
    %156 = vector.extract_strided_slice %119 {offsets = [1, 0], sizes = [1, 32], strides = [1, 1]} : vector<6x32xf32> to vector<1x32xf32>
    %cst_82 = arith.constant dense<0.000000e+00> : vector<16xf32>
    %157 = vector.multi_reduction <add>, %154, %cst_82 [1] : vector<16x32xf32> to vector<16xf32>
    %158 = vector.shape_cast %157 : vector<16xf32> to vector<16x1xf32>
    %cst_83 = arith.constant 3.200000e+01 : f32
    %159 = vector.broadcast %cst_83 : f32 to vector<16x1xf32>
    %160 = arith.divf %158, %159 : vector<16x1xf32>
    %161 = vector.broadcast %160 : vector<16x1xf32> to vector<16x32xf32>
    %162 = arith.subf %154, %161 : vector<16x32xf32>
    %163 = arith.mulf %162, %162 : vector<16x32xf32>
    %cst_84 = arith.constant dense<0.000000e+00> : vector<16xf32>
    %164 = vector.multi_reduction <add>, %163, %cst_84 [1] : vector<16x32xf32> to vector<16xf32>
    %165 = vector.shape_cast %164 : vector<16xf32> to vector<16x1xf32>
    %cst_85 = arith.constant 3.200000e+01 : f32
    %166 = vector.broadcast %cst_85 : f32 to vector<16x1xf32>
    %167 = arith.divf %165, %166 : vector<16x1xf32>
    %168 = vector.broadcast %160 : vector<16x1xf32> to vector<16x32xf32>
    %169 = arith.subf %154, %168 : vector<16x32xf32>
    %cst_86 = arith.constant 9.99999974E-6 : f32
    %170 = vector.broadcast %cst_86 : f32 to vector<16x1xf32>
    %171 = arith.addf %167, %170 : vector<16x1xf32>
    %172 = math.rsqrt %171 : vector<16x1xf32>
    %173 = vector.broadcast %172 : vector<16x1xf32> to vector<16x32xf32>
    %174 = arith.mulf %169, %173 : vector<16x32xf32>
    %175 = vector.broadcast %155 : vector<1x32xf32> to vector<16x32xf32>
    %176 = arith.mulf %174, %175 : vector<16x32xf32>
    %177 = vector.broadcast %156 : vector<1x32xf32> to vector<16x32xf32>
    %178 = arith.addf %176, %177 : vector<16x32xf32>
    %c0_87 = arith.constant 0 : index
    %c0_88 = arith.constant 0 : index
    %c0_89 = arith.constant 0 : index
    %179 = vector.load %arg6[%c0_87, %c0_88, %c0_89] : memref<2x33x32xf32, #tpu.memory_space<vmem>>, vector<1x33x32xf32>
    %180 = vector.shape_cast %179 : vector<1x33x32xf32> to vector<33x32xf32>
    %181 = vector.extract_strided_slice %180 {offsets = [0, 0], sizes = [32, 32], strides = [1, 1]} : vector<33x32xf32> to vector<32x32xf32>
    %cst_90 = arith.constant dense<0.000000e+00> : vector<16x32xf32>
    %182 = tpu.matmul %178, %181, %cst_90 {dimension_numbers = #tpu.dot_dimension_numbers<[1], [0], [0], [1], [0, 0, 1, 1], [], []>} : vector<16x32xf32>, vector<32x32xf32>, vector<16x32xf32> -> vector<16x32xf32>
    %183 = vector.extract_strided_slice %180 {offsets = [32, 0], sizes = [1, 32], strides = [1, 1]} : vector<33x32xf32> to vector<1x32xf32>
    %184 = vector.broadcast %183 : vector<1x32xf32> to vector<16x32xf32>
    %185 = arith.addf %182, %184 : vector<16x32xf32>
    %186 = vector.extract_strided_slice %117 {offsets = [0, 0], sizes = [16, 32], strides = [1, 1]} : vector<16x128xf32> to vector<16x32xf32>
    %187 = vector.shape_cast %186 : vector<16x32xf32> to vector<2x8x32xf32>
    %188 = vector.extract_strided_slice %117 {offsets = [0, 32], sizes = [16, 32], strides = [1, 1]} : vector<16x128xf32> to vector<16x32xf32>
    %189 = vector.shape_cast %188 : vector<16x32xf32> to vector<2x8x32xf32>
    %190 = vector.shape_cast %185 : vector<16x32xf32> to vector<2x8x32xf32>
    %191 = tpu.concatenate %187, %187, %187, %187 in 1 : vector<2x8x32xf32>, vector<2x8x32xf32>, vector<2x8x32xf32>, vector<2x8x32xf32> -> vector<2x32x32xf32>
    %192 = vector.shape_cast %15 : vector<32x32xf32> to vector<1x32x32xf32>
    %193 = vector.broadcast %192 : vector<1x32x32xf32> to vector<2x32x32xf32>
    %194 = arith.mulf %191, %193 : vector<2x32x32xf32>
    %195 = tpu.concatenate %189, %189, %189, %189 in 1 : vector<2x8x32xf32>, vector<2x8x32xf32>, vector<2x8x32xf32>, vector<2x8x32xf32> -> vector<2x32x32xf32>
    %196 = vector.shape_cast %31 : vector<32x32xf32> to vector<1x32x32xf32>
    %197 = vector.broadcast %196 : vector<1x32x32xf32> to vector<2x32x32xf32>
    %198 = arith.mulf %195, %197 : vector<2x32x32xf32>
    "tpu.trace_start"() <{level = 10 : i32, message = "bqd,bkd->bqk"}> : () -> ()
    %cst_91 = arith.constant dense<0.000000e+00> : vector<2x8x32xf32>
    %199 = tpu.matmul %190, %194, %cst_91 {dimension_numbers = #tpu.dot_dimension_numbers<[2], [2], [1], [1], [0, 0, 0, 1, 1, 1], [0], [0]>} : vector<2x8x32xf32>, vector<2x32x32xf32>, vector<2x8x32xf32> -> vector<2x8x32xf32>
    %cst_92 = arith.constant 1.000000e-10 : f32
    "tpu.trace_stop"() : () -> ()
    %200 = vector.broadcast %cst_92 : f32 to vector<2x8x32xf32>
    %201 = arith.select %57, %200, %199 : vector<2x8x32xi1>, vector<2x8x32xf32>
    %cst_93 = arith.constant dense<0xFF800000> : vector<2x8xf32>
    %202 = vector.multi_reduction <maximumf>, %201, %cst_93 [2] : vector<2x8x32xf32> to vector<2x8xf32>
    %203 = vector.shape_cast %202 : vector<2x8xf32> to vector<2x8x1xf32>
    %204 = vector.broadcast %203 : vector<2x8x1xf32> to vector<2x8x32xf32>
    %205 = arith.subf %201, %204 : vector<2x8x32xf32>
    %206 = math.exp %205 : vector<2x8x32xf32>
    %207 = vector.shape_cast %206 : vector<2x8x32xf32> to vector<16x32xf32>
    %cst_94 = arith.constant dense<0.000000e+00> : vector<16x32xf32>
    %208 = tpu.matmul %207, %47, %cst_94 {dimension_numbers = #tpu.dot_dimension_numbers<[1], [0], [0], [1], [0, 0, 1, 1], [], []>} : vector<16x32xf32>, vector<32x32xf32>, vector<16x32xf32> -> vector<16x32xf32>
    %209 = tpu.reciprocal %208 {approx = true} : vector<16x32xf32> -> vector<16x32xf32>
    %210 = arith.mulf %207, %209 : vector<16x32xf32>
    %211 = vector.shape_cast %210 : vector<16x32xf32> to vector<2x8x32xf32>
    "tpu.trace_start"() <{level = 10 : i32, message = "bqm,bmd->bqd"}> : () -> ()
    %cst_95 = arith.constant dense<0.000000e+00> : vector<2x8x32xf32>
    %212 = tpu.matmul %211, %198, %cst_95 {dimension_numbers = #tpu.dot_dimension_numbers<[2], [1], [1], [2], [0, 0, 0, 1, 1, 2], [0], [0]>} : vector<2x8x32xf32>, vector<2x32x32xf32>, vector<2x8x32xf32> -> vector<2x8x32xf32>
    "tpu.trace_stop"() : () -> ()
    %213 = vector.shape_cast %212 : vector<2x8x32xf32> to vector<16x32xf32>
    %214 = arith.addf %178, %213 : vector<16x32xf32>
    %215 = vector.extract_strided_slice %119 {offsets = [2, 0], sizes = [1, 32], strides = [1, 1]} : vector<6x32xf32> to vector<1x32xf32>
    %216 = vector.extract_strided_slice %119 {offsets = [3, 0], sizes = [1, 32], strides = [1, 1]} : vector<6x32xf32> to vector<1x32xf32>
    %cst_96 = arith.constant dense<0.000000e+00> : vector<16xf32>
    %217 = vector.multi_reduction <add>, %214, %cst_96 [1] : vector<16x32xf32> to vector<16xf32>
    %218 = vector.shape_cast %217 : vector<16xf32> to vector<16x1xf32>
    %cst_97 = arith.constant 3.200000e+01 : f32
    %219 = vector.broadcast %cst_97 : f32 to vector<16x1xf32>
    %220 = arith.divf %218, %219 : vector<16x1xf32>
    %221 = vector.broadcast %220 : vector<16x1xf32> to vector<16x32xf32>
    %222 = arith.subf %214, %221 : vector<16x32xf32>
    %223 = arith.mulf %222, %222 : vector<16x32xf32>
    %cst_98 = arith.constant dense<0.000000e+00> : vector<16xf32>
    %224 = vector.multi_reduction <add>, %223, %cst_98 [1] : vector<16x32xf32> to vector<16xf32>
    %225 = vector.shape_cast %224 : vector<16xf32> to vector<16x1xf32>
    %cst_99 = arith.constant 3.200000e+01 : f32
    %226 = vector.broadcast %cst_99 : f32 to vector<16x1xf32>
    %227 = arith.divf %225, %226 : vector<16x1xf32>
    %228 = vector.broadcast %220 : vector<16x1xf32> to vector<16x32xf32>
    %229 = arith.subf %214, %228 : vector<16x32xf32>
    %cst_100 = arith.constant 9.99999974E-6 : f32
    %230 = vector.broadcast %cst_100 : f32 to vector<16x1xf32>
    %231 = arith.addf %227, %230 : vector<16x1xf32>
    %232 = math.rsqrt %231 : vector<16x1xf32>
    %233 = vector.broadcast %232 : vector<16x1xf32> to vector<16x32xf32>
    %234 = arith.mulf %229, %233 : vector<16x32xf32>
    %235 = vector.broadcast %215 : vector<1x32xf32> to vector<16x32xf32>
    %236 = arith.mulf %234, %235 : vector<16x32xf32>
    %237 = vector.broadcast %216 : vector<1x32xf32> to vector<16x32xf32>
    %238 = arith.addf %236, %237 : vector<16x32xf32>
    %c0_101 = arith.constant 0 : index
    %c0_102 = arith.constant 0 : index
    %c0_103 = arith.constant 0 : index
    %239 = vector.load %arg9[%c0_101, %c0_102, %c0_103] : memref<2x33x64xf32, #tpu.memory_space<vmem>>, vector<1x33x64xf32>
    %240 = vector.shape_cast %239 : vector<1x33x64xf32> to vector<33x64xf32>
    %c0_104 = arith.constant 0 : index
    %c0_105 = arith.constant 0 : index
    %c0_106 = arith.constant 0 : index
    %241 = vector.load %arg10[%c0_104, %c0_105, %c0_106] : memref<2x65x32xf32, #tpu.memory_space<vmem>>, vector<1x65x32xf32>
    %242 = vector.shape_cast %241 : vector<1x65x32xf32> to vector<65x32xf32>
    %243 = vector.extract_strided_slice %240 {offsets = [0, 0], sizes = [32, 64], strides = [1, 1]} : vector<33x64xf32> to vector<32x64xf32>
    %cst_107 = arith.constant dense<0.000000e+00> : vector<16x64xf32>
    %244 = tpu.matmul %238, %243, %cst_107 {dimension_numbers = #tpu.dot_dimension_numbers<[1], [0], [0], [1], [0, 0, 1, 1], [], []>} : vector<16x32xf32>, vector<32x64xf32>, vector<16x64xf32> -> vector<16x64xf32>
    %245 = vector.extract_strided_slice %240 {offsets = [32, 0], sizes = [1, 64], strides = [1, 1]} : vector<33x64xf32> to vector<1x64xf32>
    %246 = vector.broadcast %245 : vector<1x64xf32> to vector<16x64xf32>
    %247 = arith.addf %244, %246 : vector<16x64xf32>
    %cst_108 = arith.constant 0.000000e+00 : f32
    %248 = vector.broadcast %cst_108 : f32 to vector<16x64xf32>
    %249 = arith.maximumf %247, %248 : vector<16x64xf32>
    %250 = vector.extract_strided_slice %242 {offsets = [0, 0], sizes = [64, 32], strides = [1, 1]} : vector<65x32xf32> to vector<64x32xf32>
    %cst_109 = arith.constant dense<0.000000e+00> : vector<16x32xf32>
    %251 = tpu.matmul %249, %250, %cst_109 {dimension_numbers = #tpu.dot_dimension_numbers<[1], [0], [0], [1], [0, 0, 1, 1], [], []>} : vector<16x64xf32>, vector<64x32xf32>, vector<16x32xf32> -> vector<16x32xf32>
    %252 = vector.extract_strided_slice %242 {offsets = [64, 0], sizes = [1, 32], strides = [1, 1]} : vector<65x32xf32> to vector<1x32xf32>
    %253 = vector.broadcast %252 : vector<1x32xf32> to vector<16x32xf32>
    %254 = arith.addf %251, %253 : vector<16x32xf32>
    %255 = arith.addf %254, %238 : vector<16x32xf32>
    %256 = vector.extract_strided_slice %119 {offsets = [4, 0], sizes = [1, 32], strides = [1, 1]} : vector<6x32xf32> to vector<1x32xf32>
    %257 = vector.extract_strided_slice %119 {offsets = [5, 0], sizes = [1, 32], strides = [1, 1]} : vector<6x32xf32> to vector<1x32xf32>
    %cst_110 = arith.constant dense<0.000000e+00> : vector<16xf32>
    %258 = vector.multi_reduction <add>, %255, %cst_110 [1] : vector<16x32xf32> to vector<16xf32>
    %259 = vector.shape_cast %258 : vector<16xf32> to vector<16x1xf32>
    %cst_111 = arith.constant 3.200000e+01 : f32
    %260 = vector.broadcast %cst_111 : f32 to vector<16x1xf32>
    %261 = arith.divf %259, %260 : vector<16x1xf32>
    %262 = vector.broadcast %261 : vector<16x1xf32> to vector<16x32xf32>
    %263 = arith.subf %255, %262 : vector<16x32xf32>
    %264 = arith.mulf %263, %263 : vector<16x32xf32>
    %cst_112 = arith.constant dense<0.000000e+00> : vector<16xf32>
    %265 = vector.multi_reduction <add>, %264, %cst_112 [1] : vector<16x32xf32> to vector<16xf32>
    %266 = vector.shape_cast %265 : vector<16xf32> to vector<16x1xf32>
    %cst_113 = arith.constant 3.200000e+01 : f32
    %267 = vector.broadcast %cst_113 : f32 to vector<16x1xf32>
    %268 = arith.divf %266, %267 : vector<16x1xf32>
    %269 = vector.broadcast %261 : vector<16x1xf32> to vector<16x32xf32>
    %270 = arith.subf %255, %269 : vector<16x32xf32>
    %cst_114 = arith.constant 9.99999974E-6 : f32
    %271 = vector.broadcast %cst_114 : f32 to vector<16x1xf32>
    %272 = arith.addf %268, %271 : vector<16x1xf32>
    %273 = math.rsqrt %272 : vector<16x1xf32>
    %274 = vector.broadcast %273 : vector<16x1xf32> to vector<16x32xf32>
    %275 = arith.mulf %270, %274 : vector<16x32xf32>
    %276 = vector.broadcast %256 : vector<1x32xf32> to vector<16x32xf32>
    %277 = arith.mulf %275, %276 : vector<16x32xf32>
    %278 = vector.broadcast %257 : vector<1x32xf32> to vector<16x32xf32>
    %279 = arith.addf %277, %278 : vector<16x32xf32>
    %c1_115 = arith.constant 1 : index
    %c0_116 = arith.constant 0 : index
    %c0_117 = arith.constant 0 : index
    %280 = vector.load %arg8[%c1_115, %c0_116, %c0_117] : memref<2x6x32xf32, #tpu.memory_space<vmem>>, vector<1x6x32xf32>
    %281 = vector.shape_cast %280 : vector<1x6x32xf32> to vector<6x32xf32>
    %c1_118 = arith.constant 1 : index
    %c0_119 = arith.constant 0 : index
    %c0_120 = arith.constant 0 : index
    %282 = vector.load %arg5[%c1_118, %c0_119, %c0_120] : memref<2x33x96xf32, #tpu.memory_space<vmem>>, vector<1x33x96xf32>
    %283 = vector.shape_cast %282 : vector<1x33x96xf32> to vector<33x96xf32>
    %284 = vector.extract_strided_slice %283 {offsets = [0, 0], sizes = [32, 96], strides = [1, 1]} : vector<33x96xf32> to vector<32x96xf32>
    %cst_121 = arith.constant dense<0.000000e+00> : vector<16x96xf32>
    %285 = tpu.matmul %279, %284, %cst_121 {dimension_numbers = #tpu.dot_dimension_numbers<[1], [0], [0], [1], [0, 0, 1, 1], [], []>} : vector<16x32xf32>, vector<32x96xf32>, vector<16x96xf32> -> vector<16x96xf32>
    %286 = vector.extract_strided_slice %283 {offsets = [32, 0], sizes = [1, 96], strides = [1, 1]} : vector<33x96xf32> to vector<1x96xf32>
    %287 = vector.broadcast %286 : vector<1x96xf32> to vector<16x96xf32>
    %288 = arith.addf %285, %287 : vector<16x96xf32>
    %289 = vector.shape_cast %288 : vector<16x96xf32> to vector<2x8x96xf32>
    %290 = vector.extract_strided_slice %289 {offsets = [0, 0, 0], sizes = [2, 8, 32], strides = [1, 1, 1]} : vector<2x8x96xf32> to vector<2x8x32xf32>
    %291 = vector.extract_strided_slice %289 {offsets = [0, 0, 32], sizes = [2, 8, 32], strides = [1, 1, 1]} : vector<2x8x96xf32> to vector<2x8x32xf32>
    %292 = vector.extract_strided_slice %289 {offsets = [0, 0, 64], sizes = [2, 8, 32], strides = [1, 1, 1]} : vector<2x8x96xf32> to vector<2x8x32xf32>
    %293 = tpu.concatenate %291, %291, %291, %291 in 1 : vector<2x8x32xf32>, vector<2x8x32xf32>, vector<2x8x32xf32>, vector<2x8x32xf32> -> vector<2x32x32xf32>
    %294 = vector.shape_cast %15 : vector<32x32xf32> to vector<1x32x32xf32>
    %295 = vector.broadcast %294 : vector<1x32x32xf32> to vector<2x32x32xf32>
    %296 = arith.mulf %293, %295 : vector<2x32x32xf32>
    %297 = tpu.concatenate %292, %292, %292, %292 in 1 : vector<2x8x32xf32>, vector<2x8x32xf32>, vector<2x8x32xf32>, vector<2x8x32xf32> -> vector<2x32x32xf32>
    %298 = vector.shape_cast %31 : vector<32x32xf32> to vector<1x32x32xf32>
    %299 = vector.broadcast %298 : vector<1x32x32xf32> to vector<2x32x32xf32>
    %300 = arith.mulf %297, %299 : vector<2x32x32xf32>
    "tpu.trace_start"() <{level = 10 : i32, message = "bqd,bkd->bqk"}> : () -> ()
    %cst_122 = arith.constant dense<0.000000e+00> : vector<2x8x32xf32>
    %301 = tpu.matmul %290, %296, %cst_122 {dimension_numbers = #tpu.dot_dimension_numbers<[2], [2], [1], [1], [0, 0, 0, 1, 1, 1], [0], [0]>} : vector<2x8x32xf32>, vector<2x32x32xf32>, vector<2x8x32xf32> -> vector<2x8x32xf32>
    %cst_123 = arith.constant 1.000000e-10 : f32
    "tpu.trace_stop"() : () -> ()
    %302 = vector.broadcast %cst_123 : f32 to vector<2x8x32xf32>
    %303 = arith.select %51, %302, %301 : vector<2x8x32xi1>, vector<2x8x32xf32>
    %cst_124 = arith.constant dense<0xFF800000> : vector<2x8xf32>
    %304 = vector.multi_reduction <maximumf>, %303, %cst_124 [2] : vector<2x8x32xf32> to vector<2x8xf32>
    %305 = vector.shape_cast %304 : vector<2x8xf32> to vector<2x8x1xf32>
    %306 = vector.broadcast %305 : vector<2x8x1xf32> to vector<2x8x32xf32>
    %307 = arith.subf %303, %306 : vector<2x8x32xf32>
    %308 = math.exp %307 : vector<2x8x32xf32>
    %309 = vector.shape_cast %308 : vector<2x8x32xf32> to vector<16x32xf32>
    %cst_125 = arith.constant dense<0.000000e+00> : vector<16x32xf32>
    %310 = tpu.matmul %309, %47, %cst_125 {dimension_numbers = #tpu.dot_dimension_numbers<[1], [0], [0], [1], [0, 0, 1, 1], [], []>} : vector<16x32xf32>, vector<32x32xf32>, vector<16x32xf32> -> vector<16x32xf32>
    %311 = tpu.reciprocal %310 {approx = true} : vector<16x32xf32> -> vector<16x32xf32>
    %312 = arith.mulf %309, %311 : vector<16x32xf32>
    %313 = vector.shape_cast %312 : vector<16x32xf32> to vector<2x8x32xf32>
    "tpu.trace_start"() <{level = 10 : i32, message = "bqm,bmd->bqd"}> : () -> ()
    %cst_126 = arith.constant dense<0.000000e+00> : vector<2x8x32xf32>
    %314 = tpu.matmul %313, %300, %cst_126 {dimension_numbers = #tpu.dot_dimension_numbers<[2], [1], [1], [2], [0, 0, 0, 1, 1, 2], [0], [0]>} : vector<2x8x32xf32>, vector<2x32x32xf32>, vector<2x8x32xf32> -> vector<2x8x32xf32>
    "tpu.trace_stop"() : () -> ()
    %315 = vector.shape_cast %314 : vector<2x8x32xf32> to vector<16x32xf32>
    %316 = arith.addf %279, %315 : vector<16x32xf32>
    %317 = vector.extract_strided_slice %281 {offsets = [0, 0], sizes = [1, 32], strides = [1, 1]} : vector<6x32xf32> to vector<1x32xf32>
    %318 = vector.extract_strided_slice %281 {offsets = [1, 0], sizes = [1, 32], strides = [1, 1]} : vector<6x32xf32> to vector<1x32xf32>
    %cst_127 = arith.constant dense<0.000000e+00> : vector<16xf32>
    %319 = vector.multi_reduction <add>, %316, %cst_127 [1] : vector<16x32xf32> to vector<16xf32>
    %320 = vector.shape_cast %319 : vector<16xf32> to vector<16x1xf32>
    %cst_128 = arith.constant 3.200000e+01 : f32
    %321 = vector.broadcast %cst_128 : f32 to vector<16x1xf32>
    %322 = arith.divf %320, %321 : vector<16x1xf32>
    %323 = vector.broadcast %322 : vector<16x1xf32> to vector<16x32xf32>
    %324 = arith.subf %316, %323 : vector<16x32xf32>
    %325 = arith.mulf %324, %324 : vector<16x32xf32>
    %cst_129 = arith.constant dense<0.000000e+00> : vector<16xf32>
    %326 = vector.multi_reduction <add>, %325, %cst_129 [1] : vector<16x32xf32> to vector<16xf32>
    %327 = vector.shape_cast %326 : vector<16xf32> to vector<16x1xf32>
    %cst_130 = arith.constant 3.200000e+01 : f32
    %328 = vector.broadcast %cst_130 : f32 to vector<16x1xf32>
    %329 = arith.divf %327, %328 : vector<16x1xf32>
    %330 = vector.broadcast %322 : vector<16x1xf32> to vector<16x32xf32>
    %331 = arith.subf %316, %330 : vector<16x32xf32>
    %cst_131 = arith.constant 9.99999974E-6 : f32
    %332 = vector.broadcast %cst_131 : f32 to vector<16x1xf32>
    %333 = arith.addf %329, %332 : vector<16x1xf32>
    %334 = math.rsqrt %333 : vector<16x1xf32>
    %335 = vector.broadcast %334 : vector<16x1xf32> to vector<16x32xf32>
    %336 = arith.mulf %331, %335 : vector<16x32xf32>
    %337 = vector.broadcast %317 : vector<1x32xf32> to vector<16x32xf32>
    %338 = arith.mulf %336, %337 : vector<16x32xf32>
    %339 = vector.broadcast %318 : vector<1x32xf32> to vector<16x32xf32>
    %340 = arith.addf %338, %339 : vector<16x32xf32>
    %c1_132 = arith.constant 1 : index
    %c0_133 = arith.constant 0 : index
    %c0_134 = arith.constant 0 : index
    %341 = vector.load %arg6[%c1_132, %c0_133, %c0_134] : memref<2x33x32xf32, #tpu.memory_space<vmem>>, vector<1x33x32xf32>
    %342 = vector.shape_cast %341 : vector<1x33x32xf32> to vector<33x32xf32>
    %343 = vector.extract_strided_slice %342 {offsets = [0, 0], sizes = [32, 32], strides = [1, 1]} : vector<33x32xf32> to vector<32x32xf32>
    %cst_135 = arith.constant dense<0.000000e+00> : vector<16x32xf32>
    %344 = tpu.matmul %340, %343, %cst_135 {dimension_numbers = #tpu.dot_dimension_numbers<[1], [0], [0], [1], [0, 0, 1, 1], [], []>} : vector<16x32xf32>, vector<32x32xf32>, vector<16x32xf32> -> vector<16x32xf32>
    %345 = vector.extract_strided_slice %342 {offsets = [32, 0], sizes = [1, 32], strides = [1, 1]} : vector<33x32xf32> to vector<1x32xf32>
    %346 = vector.broadcast %345 : vector<1x32xf32> to vector<16x32xf32>
    %347 = arith.addf %344, %346 : vector<16x32xf32>
    %348 = vector.extract_strided_slice %117 {offsets = [0, 64], sizes = [16, 32], strides = [1, 1]} : vector<16x128xf32> to vector<16x32xf32>
    %349 = vector.shape_cast %348 : vector<16x32xf32> to vector<2x8x32xf32>
    %350 = vector.extract_strided_slice %117 {offsets = [0, 96], sizes = [16, 32], strides = [1, 1]} : vector<16x128xf32> to vector<16x32xf32>
    %351 = vector.shape_cast %350 : vector<16x32xf32> to vector<2x8x32xf32>
    %352 = vector.shape_cast %347 : vector<16x32xf32> to vector<2x8x32xf32>
    %353 = tpu.concatenate %349, %349, %349, %349 in 1 : vector<2x8x32xf32>, vector<2x8x32xf32>, vector<2x8x32xf32>, vector<2x8x32xf32> -> vector<2x32x32xf32>
    %354 = vector.shape_cast %15 : vector<32x32xf32> to vector<1x32x32xf32>
    %355 = vector.broadcast %354 : vector<1x32x32xf32> to vector<2x32x32xf32>
    %356 = arith.mulf %353, %355 : vector<2x32x32xf32>
    %357 = tpu.concatenate %351, %351, %351, %351 in 1 : vector<2x8x32xf32>, vector<2x8x32xf32>, vector<2x8x32xf32>, vector<2x8x32xf32> -> vector<2x32x32xf32>
    %358 = vector.shape_cast %31 : vector<32x32xf32> to vector<1x32x32xf32>
    %359 = vector.broadcast %358 : vector<1x32x32xf32> to vector<2x32x32xf32>
    %360 = arith.mulf %357, %359 : vector<2x32x32xf32>
    "tpu.trace_start"() <{level = 10 : i32, message = "bqd,bkd->bqk"}> : () -> ()
    %cst_136 = arith.constant dense<0.000000e+00> : vector<2x8x32xf32>
    %361 = tpu.matmul %352, %356, %cst_136 {dimension_numbers = #tpu.dot_dimension_numbers<[2], [2], [1], [1], [0, 0, 0, 1, 1, 1], [0], [0]>} : vector<2x8x32xf32>, vector<2x32x32xf32>, vector<2x8x32xf32> -> vector<2x8x32xf32>
    %cst_137 = arith.constant 1.000000e-10 : f32
    "tpu.trace_stop"() : () -> ()
    %362 = vector.broadcast %cst_137 : f32 to vector<2x8x32xf32>
    %363 = arith.select %57, %362, %361 : vector<2x8x32xi1>, vector<2x8x32xf32>
    %cst_138 = arith.constant dense<0xFF800000> : vector<2x8xf32>
    %364 = vector.multi_reduction <maximumf>, %363, %cst_138 [2] : vector<2x8x32xf32> to vector<2x8xf32>
    %365 = vector.shape_cast %364 : vector<2x8xf32> to vector<2x8x1xf32>
    %366 = vector.broadcast %365 : vector<2x8x1xf32> to vector<2x8x32xf32>
    %367 = arith.subf %363, %366 : vector<2x8x32xf32>
    %368 = math.exp %367 : vector<2x8x32xf32>
    %369 = vector.shape_cast %368 : vector<2x8x32xf32> to vector<16x32xf32>
    %cst_139 = arith.constant dense<0.000000e+00> : vector<16x32xf32>
    %370 = tpu.matmul %369, %47, %cst_139 {dimension_numbers = #tpu.dot_dimension_numbers<[1], [0], [0], [1], [0, 0, 1, 1], [], []>} : vector<16x32xf32>, vector<32x32xf32>, vector<16x32xf32> -> vector<16x32xf32>
    %371 = tpu.reciprocal %370 {approx = true} : vector<16x32xf32> -> vector<16x32xf32>
    %372 = arith.mulf %369, %371 : vector<16x32xf32>
    %373 = vector.shape_cast %372 : vector<16x32xf32> to vector<2x8x32xf32>
    "tpu.trace_start"() <{level = 10 : i32, message = "bqm,bmd->bqd"}> : () -> ()
    %cst_140 = arith.constant dense<0.000000e+00> : vector<2x8x32xf32>
    %374 = tpu.matmul %373, %360, %cst_140 {dimension_numbers = #tpu.dot_dimension_numbers<[2], [1], [1], [2], [0, 0, 0, 1, 1, 2], [0], [0]>} : vector<2x8x32xf32>, vector<2x32x32xf32>, vector<2x8x32xf32> -> vector<2x8x32xf32>
    "tpu.trace_stop"() : () -> ()
    %375 = vector.shape_cast %374 : vector<2x8x32xf32> to vector<16x32xf32>
    %376 = arith.addf %340, %375 : vector<16x32xf32>
    %377 = vector.extract_strided_slice %281 {offsets = [2, 0], sizes = [1, 32], strides = [1, 1]} : vector<6x32xf32> to vector<1x32xf32>
    %378 = vector.extract_strided_slice %281 {offsets = [3, 0], sizes = [1, 32], strides = [1, 1]} : vector<6x32xf32> to vector<1x32xf32>
    %cst_141 = arith.constant dense<0.000000e+00> : vector<16xf32>
    %379 = vector.multi_reduction <add>, %376, %cst_141 [1] : vector<16x32xf32> to vector<16xf32>
    %380 = vector.shape_cast %379 : vector<16xf32> to vector<16x1xf32>
    %cst_142 = arith.constant 3.200000e+01 : f32
    %381 = vector.broadcast %cst_142 : f32 to vector<16x1xf32>
    %382 = arith.divf %380, %381 : vector<16x1xf32>
    %383 = vector.broadcast %382 : vector<16x1xf32> to vector<16x32xf32>
    %384 = arith.subf %376, %383 : vector<16x32xf32>
    %385 = arith.mulf %384, %384 : vector<16x32xf32>
    %cst_143 = arith.constant dense<0.000000e+00> : vector<16xf32>
    %386 = vector.multi_reduction <add>, %385, %cst_143 [1] : vector<16x32xf32> to vector<16xf32>
    %387 = vector.shape_cast %386 : vector<16xf32> to vector<16x1xf32>
    %cst_144 = arith.constant 3.200000e+01 : f32
    %388 = vector.broadcast %cst_144 : f32 to vector<16x1xf32>
    %389 = arith.divf %387, %388 : vector<16x1xf32>
    %390 = vector.broadcast %382 : vector<16x1xf32> to vector<16x32xf32>
    %391 = arith.subf %376, %390 : vector<16x32xf32>
    %cst_145 = arith.constant 9.99999974E-6 : f32
    %392 = vector.broadcast %cst_145 : f32 to vector<16x1xf32>
    %393 = arith.addf %389, %392 : vector<16x1xf32>
    %394 = math.rsqrt %393 : vector<16x1xf32>
    %395 = vector.broadcast %394 : vector<16x1xf32> to vector<16x32xf32>
    %396 = arith.mulf %391, %395 : vector<16x32xf32>
    %397 = vector.broadcast %377 : vector<1x32xf32> to vector<16x32xf32>
    %398 = arith.mulf %396, %397 : vector<16x32xf32>
    %399 = vector.broadcast %378 : vector<1x32xf32> to vector<16x32xf32>
    %400 = arith.addf %398, %399 : vector<16x32xf32>
    %c1_146 = arith.constant 1 : index
    %c0_147 = arith.constant 0 : index
    %c0_148 = arith.constant 0 : index
    %401 = vector.load %arg9[%c1_146, %c0_147, %c0_148] : memref<2x33x64xf32, #tpu.memory_space<vmem>>, vector<1x33x64xf32>
    %402 = vector.shape_cast %401 : vector<1x33x64xf32> to vector<33x64xf32>
    %c1_149 = arith.constant 1 : index
    %c0_150 = arith.constant 0 : index
    %c0_151 = arith.constant 0 : index
    %403 = vector.load %arg10[%c1_149, %c0_150, %c0_151] : memref<2x65x32xf32, #tpu.memory_space<vmem>>, vector<1x65x32xf32>
    %404 = vector.shape_cast %403 : vector<1x65x32xf32> to vector<65x32xf32>
    %405 = vector.extract_strided_slice %402 {offsets = [0, 0], sizes = [32, 64], strides = [1, 1]} : vector<33x64xf32> to vector<32x64xf32>
    %cst_152 = arith.constant dense<0.000000e+00> : vector<16x64xf32>
    %406 = tpu.matmul %400, %405, %cst_152 {dimension_numbers = #tpu.dot_dimension_numbers<[1], [0], [0], [1], [0, 0, 1, 1], [], []>} : vector<16x32xf32>, vector<32x64xf32>, vector<16x64xf32> -> vector<16x64xf32>
    %407 = vector.extract_strided_slice %402 {offsets = [32, 0], sizes = [1, 64], strides = [1, 1]} : vector<33x64xf32> to vector<1x64xf32>
    %408 = vector.broadcast %407 : vector<1x64xf32> to vector<16x64xf32>
    %409 = arith.addf %406, %408 : vector<16x64xf32>
    %cst_153 = arith.constant 0.000000e+00 : f32
    %410 = vector.broadcast %cst_153 : f32 to vector<16x64xf32>
    %411 = arith.maximumf %409, %410 : vector<16x64xf32>
    %412 = vector.extract_strided_slice %404 {offsets = [0, 0], sizes = [64, 32], strides = [1, 1]} : vector<65x32xf32> to vector<64x32xf32>
    %cst_154 = arith.constant dense<0.000000e+00> : vector<16x32xf32>
    %413 = tpu.matmul %411, %412, %cst_154 {dimension_numbers = #tpu.dot_dimension_numbers<[1], [0], [0], [1], [0, 0, 1, 1], [], []>} : vector<16x64xf32>, vector<64x32xf32>, vector<16x32xf32> -> vector<16x32xf32>
    %414 = vector.extract_strided_slice %404 {offsets = [64, 0], sizes = [1, 32], strides = [1, 1]} : vector<65x32xf32> to vector<1x32xf32>
    %415 = vector.broadcast %414 : vector<1x32xf32> to vector<16x32xf32>
    %416 = arith.addf %413, %415 : vector<16x32xf32>
    %417 = arith.addf %416, %400 : vector<16x32xf32>
    %418 = vector.extract_strided_slice %281 {offsets = [4, 0], sizes = [1, 32], strides = [1, 1]} : vector<6x32xf32> to vector<1x32xf32>
    %419 = vector.extract_strided_slice %281 {offsets = [5, 0], sizes = [1, 32], strides = [1, 1]} : vector<6x32xf32> to vector<1x32xf32>
    %cst_155 = arith.constant dense<0.000000e+00> : vector<16xf32>
    %420 = vector.multi_reduction <add>, %417, %cst_155 [1] : vector<16x32xf32> to vector<16xf32>
    %421 = vector.shape_cast %420 : vector<16xf32> to vector<16x1xf32>
    %cst_156 = arith.constant 3.200000e+01 : f32
    %422 = vector.broadcast %cst_156 : f32 to vector<16x1xf32>
    %423 = arith.divf %421, %422 : vector<16x1xf32>
    %424 = vector.broadcast %423 : vector<16x1xf32> to vector<16x32xf32>
    %425 = arith.subf %417, %424 : vector<16x32xf32>
    %426 = arith.mulf %425, %425 : vector<16x32xf32>
    %cst_157 = arith.constant dense<0.000000e+00> : vector<16xf32>
    %427 = vector.multi_reduction <add>, %426, %cst_157 [1] : vector<16x32xf32> to vector<16xf32>
    %428 = vector.shape_cast %427 : vector<16xf32> to vector<16x1xf32>
    %cst_158 = arith.constant 3.200000e+01 : f32
    %429 = vector.broadcast %cst_158 : f32 to vector<16x1xf32>
    %430 = arith.divf %428, %429 : vector<16x1xf32>
    %431 = vector.broadcast %423 : vector<16x1xf32> to vector<16x32xf32>
    %432 = arith.subf %417, %431 : vector<16x32xf32>
    %cst_159 = arith.constant 9.99999974E-6 : f32
    %433 = vector.broadcast %cst_159 : f32 to vector<16x1xf32>
    %434 = arith.addf %430, %433 : vector<16x1xf32>
    %435 = math.rsqrt %434 : vector<16x1xf32>
    %436 = vector.broadcast %435 : vector<16x1xf32> to vector<16x32xf32>
    %437 = arith.mulf %432, %436 : vector<16x32xf32>
    %438 = vector.broadcast %418 : vector<1x32xf32> to vector<16x32xf32>
    %439 = arith.mulf %437, %438 : vector<16x32xf32>
    %440 = vector.broadcast %419 : vector<1x32xf32> to vector<16x32xf32>
    %441 = arith.addf %439, %440 : vector<16x32xf32>
    %c0_160 = arith.constant 0 : index
    %c0_161 = arith.constant 0 : index
    %442 = vector.load %arg11[%c0_160, %c0_161] : memref<33x128xf32, #tpu.memory_space<vmem>>, vector<33x128xf32>
    %443 = vector.extract_strided_slice %442 {offsets = [0, 0], sizes = [32, 128], strides = [1, 1]} : vector<33x128xf32> to vector<32x128xf32>
    %cst_162 = arith.constant dense<0.000000e+00> : vector<16x128xf32>
    %444 = tpu.matmul %441, %443, %cst_162 {dimension_numbers = #tpu.dot_dimension_numbers<[1], [0], [0], [1], [0, 0, 1, 1], [], []>} : vector<16x32xf32>, vector<32x128xf32>, vector<16x128xf32> -> vector<16x128xf32>
    %445 = vector.extract_strided_slice %442 {offsets = [32, 0], sizes = [1, 128], strides = [1, 1]} : vector<33x128xf32> to vector<1x128xf32>
    %446 = vector.broadcast %445 : vector<1x128xf32> to vector<16x128xf32>
    %447 = arith.addf %444, %446 : vector<16x128xf32>
    %c0_163 = arith.constant 0 : index
    %c0_164 = arith.constant 0 : index
    %448 = vector.load %arg12[%c0_163, %c0_164] : memref<16x128xf32, #tpu.memory_space<vmem>>, vector<16x128xf32>
    tpu.vector_store %arg12[%c0_163, %c0_164], %447 {strides = array<i32>} : memref<16x128xf32, #tpu.memory_space<vmem>>, vector<16x128xf32>,
    return
  }
}

</mosaic_0001>

<bundles_post_ra>
// kernel: decoder_forward.1
= control target key start
LH: loop header
LB: loop body
LE: loop exit
PB: predicated region body
PF: predicated region fallthrough
CT: control target
= control target key end

     0   :  { %s5551_s0 = inlined_call_operand.vmem [shape: s32[2,8], index: 0, kind: input, shape index: {}]   ;;  %s5552_s1 = inlined_call_operand.vmem [shape: f32[2,8,32], index: 1, kind: input, shape index: {}]   ;;  %s5553_s2 = inlined_call_operand.vmem [shape: f32[2,8,8], index: 2, kind: input, shape index: {}]   ;;  %s5554_s3 = inlined_call_operand.vmem [shape: f32[2,1,8], index: 3, kind: input, shape index: {}]   ;;  %s5555_s4 = inlined_call_operand.vmem [shape: f32[72,32], index: 4, kind: input, shape index: {}]   ;;  %s5556_s5 = inlined_call_operand.vmem [shape: f32[2,33,96], index: 5, kind: input, shape index: {}]   ;;  %s5557_s6 = inlined_call_operand.vmem [shape: f32[2,33,32], index: 6, kind: input, shape index: {}]   ;;  %s5558_s7 = inlined_call_operand.vmem [shape: f32[33,128], index: 7, kind: input, shape index: {}]   ;;  %s5559_s8 = inlined_call_operand.vmem [shape: f32[2,6,32], index: 8, kind: input, shape index: {}]   ;;  %s5560_s9 = inlined_call_operand.vmem [shape: f32[2,33,64], index: 9, kind: input, shape index: {}]   ;;  %s5561_s10 = inlined_call_operand.vmem [shape: f32[2,65,32], index: 10, kind: input, shape index: {}]   ;;  %s5562_s11 = inlined_call_operand.vmem [shape: f32[33,128], index: 11, kind: input, shape index: {}]   ;;  %s5563_s12 = inlined_call_operand.vmem [shape: f32[16,128], index: 12, kind: output, shape index: {}]  }
   0x1   :  { %5565 = sst [smem:[#allocation5_spill]] %s5563_s12 }
   0x2   :  { %17 = vsyncpa [#allocation3], 0  ;;  %s24_s23 = sshll.u32 %s5551_s0, 4  ;;  %s25_s23 = int_to_ptr.vmem [resolvable:$true] %s24_s23 }
   0x3   :  { %s4541_s24 = scalar_lea.vmem %s25_s23, 32  ;;  %p4546_p1 = scmp.lt.s32.totalorder %s25_s23, %s25_s23 }
   0x4   :  { %p4542_p0 = scmp.ne.s32.totalorder %s25_s23, %s4541_s24  ;;  %p4547_p2 = scmp.lt.s32.totalorder %s4541_s24, %s4541_s24 }
   0x6   :  { %p4548_p3 = por %p4547_p2, %p4546_p1 }
   0x8   :  { %p4549_p4 = pnand %p4548_p3, %p4542_p0 }
   0xa   :  { %4552 = shalt.err (!%p4549_p4)
}
   0xb   :  { %s4555_s25 = smov [#allocation2]  }
   0xc   :  { %27 = dma.vmem_to_smem %s25_s23, 32, %s4555_s25, [#allocation3]  }
   0xd   :  { %4553 = dma.done.wait [#allocation3], 32  }
   0xe   :  { %4554 = vsyncadd [#allocation3], 4294967264 }
   0xf   :  { %53 = sfence }
  0x10   :  { %v279_v0 = vld [vmem:[%s5558_s7] sm:$0xff]  ;;  %v280_v1 = vld [vmem:[%s5558_s7 + $0x8] sm:$0xff]  ;;  %vm288_vm0 = vcmask 261120   ;;  %s4643_s13 = sld [smem:[#allocation2]]  ;;  %v281_v5 = vld [vmem:[%s5558_s7 + $0x10] sm:$0xff]  ;;  %s4654_s20 = sld [smem:[#allocation2 + $0x1]]  ;;  %v54_v12 = vlaneseq }
  0x11   :  { %v371_v2 = vld [vmem:[%s5556_s5] sm:$0xff]  ;;  %v4064_v3 = vpack.c.bf16 %v280_v1, %v279_v0  ;;  %v372_v4 = vld [vmem:[%s5556_s5 + $0x8] sm:$0xff]  ;;  %v282_v6 = vld [vmem:[%s5558_s7 + $0x18] sm:$0xff]  ;;  %s4665_s27 = sld [smem:[#allocation2 + $0x2]]  ;;  %s4668_s28 = sld [smem:[#allocation2 + $0x3]]  ;;  %vm253_vm1 = vcmask 1040384  }
  0x12   :  { %v4072_v7 = vpack.c.bf16 %v372_v4, %v371_v2  ;;  %v4068_v8 = vpack.c.bf16 %v282_v6, %v281_v5  ;;  %v373_v9 = vld [vmem:[%s5556_s5 + $0x10] sm:$0xff]  ;;  %v374_v10 = vld [vmem:[%s5556_s5 + $0x18] sm:$0xff]  ;;  %v277_v11 = vld [vmem:[%s5552_s1] sm:$0xff]  ;;  %s4670_s29 = sld [smem:[#allocation2 + $0x4]]  ;;  %s4672_s0 = sld [smem:[#allocation2 + $0x5]]  ;;  %vm255_vm2 = vcmask 1041408  }
  0x13   :  { %4065 = vmatprep.subr.bf16.mxu0 %v4064_v3  ;;  %v4076_v13 = vpack.c.bf16 %v374_v10, %v373_v9  ;;  %3726 = vmatprep.mubr.msk.f32.mxu0 %vm288_vm0, %v277_v11  ;;  %s4674_s30 = sld [smem:[#allocation2 + $0x6]]  ;;  %vm257_vm3 = vcmask 1042432   ;;  %s4676_s14 = sld [smem:[#allocation2 + $0x7]]  ;;  %vm259_vm4 = vcmask 1043456   ;;  %vm261_vm5 = vcmask 1044480   ;;  %v278_v17 = vld [vmem:[%s5552_s1 + $0x8] sm:$0xff]  ;;  %vm4895_vm15 = vmpackc.low %vm288_vm0, %vm288_vm0 }
  0x14   :  { %4073 = vmatprep.subr.bf16.mxu1 %v4072_v7  ;;  %4067 = vmatpush3.bf16.msra.mxu0 %v4064_v3  ;;  %s4678_s15 = sld [smem:[#allocation2 + $0x80]]  ;;  %s4684_s19 = sld [smem:[#allocation2 + $0x81]]  ;;  %vm263_vm6 = vcmask 1045504   ;;  %vm265_vm7 = vcmask 1046528   ;;  %v4686_v14 = vshrl.u32 %v54_v12, 7  ;;  %v60_v15 = vand.u32 127, %v54_v12 }
  0x15   :  { %4075 = vmatpush3.bf16.msra.mxu1 %v4072_v7  ;;  %4069 = vmatprep.subr.bf16.mxu0 %v4068_v8  ;;  %s4692_s24 = sld [smem:[#allocation2 + $0x82]]  ;;  %s4701_s12 = sld [smem:[#allocation2 + $0x83]]  ;;  %v274_v44 = vld [vmem:[%s5555_s4 + $0x38] sm:$0xff]  ;;  %v4556_v5 = vmov 0.0   ;;  %vm4560_vm14 = vmmov 0  }
  0x16   :  { %4077 = vmatprep.subr.bf16.mxu1 %v4076_v13  ;;  %s164_s18 = scalar_lea.vmem %s5555_s4, %s4643_s13  ;;  %s167_s23 = scalar_lea.vmem %s5555_s4, %s4654_s20  ;;  %v56_v19 = vadd.s32 8, %v4686_v14  ;;  %v61_v20 = vand.u32 7, %v4686_v14  ;;  %v73_v23 = vand.u32 7, %v60_v15  ;;  %v57_v24 = vadd.s32 16, %v4686_v14 }
  0x17   :  { %v165_v16 = vld [vmem:[%s164_s18] sm:$0x1]  ;;  %s170_s17 = scalar_lea.vmem %s5555_s4, %s4665_s27  ;;  %s173_s1 = scalar_lea.vmem %s5555_s4, %s4668_s28  ;;  %v4715_v25 = vadd.s32 24, %v4686_v14 }
  0x18   :  { %4071 = vmatpush3.bf16.msra.mxu0 %v4068_v8  ;;  %v168_v18 = vld [vmem:[%s167_s23] sm:$0x1]  ;;  %s176_s23 = scalar_lea.vmem %s5555_s4, %s4670_s29  ;;  %s179_s26 = scalar_lea.vmem %s5555_s4, %s4672_s0  ;;  %v62_v29 = vand.u32 7, %v56_v19  ;;  %v65_v35 = vsub.s32 %v4686_v14, %v61_v20  ;;  %v74_v45 = vsub.s32 %v60_v15, %v73_v23  ;;  %v63_v61 = vand.u32 7, %v57_v24 }
  0x19   :  { %4079 = vmatpush3.bf16.msra.mxu1 %v4076_v13  ;;  %v171_v21 = vld [vmem:[%s170_s17] sm:$0x1]  ;;  %v212_v22 = vrot.slane %v168_v18, 7  ;;  %s182_s16 = scalar_lea.vmem %s5555_s4, %s4674_s30  ;;  %s185_s20 = scalar_lea.vmem %s5555_s4, %s4676_s14  ;;  %v64_v63 = vand.u32 7, %v4715_v25 }
  0x1a   :  { %v174_v26 = vld [vmem:[%s173_s1] sm:$0x1]  ;;  %v215_v28 = vrot.slane %v171_v21, 6  ;;  %s188_s21 = scalar_lea.vmem %s5555_s4, %s4678_s15  ;;  %s191_s22 = scalar_lea.vmem %s5555_s4, %s4684_s19  ;;  %v66_v39 = vsub.s32 %v56_v19, %v62_v29  ;;  %v69_v53 = vmul.u32 8, %v65_v35  ;;  %v75_v60 = vmul.u32 8, %v74_v45 }
  0x1b   :  { %v177_v27 = vld [vmem:[%s176_s23] sm:$0x1]  ;;  %v218_v32 = vrot.slane %v174_v26, 5  ;;  %v254_v34 = vsel %vm253_vm1, %v165_v16, %v212_v22  ;;  %3727 = vmatmul.mubr.msk.f32.vlgmr.msra.gmra.mrb[0].mxu0 %vm288_vm0, %v278_v17  ;;  %s4740_s14 = sld [smem:[#allocation2 + $0x84]]  ;;  %s194_s27 = scalar_lea.vmem %s5555_s4, %s4692_s24  ;;  %v67_v2 = vsub.s32 %v57_v24, %v63_v61  ;;  %v68_v9 = vsub.s32 %v4715_v25, %v64_v63 }
  0x1c   :  { %v180_v30 = vld [vmem:[%s179_s26] sm:$0x1]  ;;  %v221_v33 = vrot.slane %v177_v27, 4  ;;  %v256_v38 = vsel %vm255_vm2, %v254_v34, %v215_v28  ;;  %s4747_s25 = sld [smem:[#allocation2 + $0x85]]  ;;  %s4757_s29 = sld [smem:[#allocation2 + $0x86]]  ;;  %v70_v57 = vmul.u32 8, %v66_v39  ;;  %vm76_vm8 = vcmp.eq.s32.totalorder %v69_v53, %v75_v60  ;;  %3748 = vmatprep.mubr.msk.f32.mxu0 %vm4560_vm14, %v4556_v5 }
  0x1d   :  { %v183_v31 = vld [vmem:[%s182_s16] sm:$0x1]  ;;  %v224_v41 = vrot.slane %v180_v30, 3  ;;  %v258_v43 = vsel %vm257_vm3, %v256_v38, %v218_v32  ;;  %s197_s16 = scalar_lea.vmem %s5555_s4, %s4701_s12  ;;  %s4760_s24 = sld [smem:[#allocation2 + $0x87]]  ;;  %v4786_v6 = vsel %vm76_vm8, 1.0, %v4556_v5  ;;  %v71_v13 = vmul.u32 8, %v67_v2 }
  0x1e   :  { %v186_v36 = vld [vmem:[%s185_s20] sm:$0x1]  ;;  %v227_v42 = vrot.slane %v183_v31, 2  ;;  %v260_v49 = vsel %vm259_vm4, %v258_v43, %v221_v33  ;;  %vm77_vm9 = vcmp.eq.s32.totalorder %v70_v57, %v75_v60  ;;  %v72_v18 = vmul.u32 8, %v68_v9  ;;  %v85_v57 = vld [vmem:[%s5553_s2 + $0x8] sm:$0xff]  ;;  %s4562_s12 = smov 16  }
  0x1f   :  { %v189_v37 = vld [vmem:[%s188_s21] sm:$0x1]  ;;  %v230_v47 = vrot.slane %v186_v36, 1  ;;  %v262_v52 = vsel %vm261_vm5, %v260_v49, %v224_v41  ;;  %v4789_v7 = vsel %vm77_vm9, 1.0, %v4556_v5  ;;  %vm4791_vm10 = vmpackc.low %vm77_vm9, %vm76_vm8  ;;  %vm78_vm11 = vcmp.eq.s32.totalorder %v71_v13, %v75_v60  ;;  %s4563_s17 = smov 24   ;;  %s5576_s0 = sld [smem:[#allocation5_spill]] }
  0x20   :  { %v192_v40 = vld [vmem:[%s191_s22] sm:$0x1]  ;;  %v264_v55 = vsel %vm263_vm6, %v262_v52, %v227_v42  ;;  %v4802_v12 = vpack.i.bf16 %v4789_v7, %v4786_v6  ;;  %vm79_vm12 = vcmp.eq.s32.totalorder %v72_v18, %v75_v60  ;;  %v4810_v22 = vsel %vm78_vm11, 1.0, %v4556_v5 }
  0x21   :  { %v195_v46 = vld [vmem:[%s194_s27] sm:$0x1]  ;;  %v233_v48 = vrot.slane %v192_v40, 7  ;;  %v266_v58 = vsel %vm265_vm7, %v264_v55, %v230_v47  ;;  %s200_s20 = scalar_lea.vmem %s5555_s4, %s4740_s14  ;;  %s4557_s27 = smov 32   ;;  %v4814_v24 = vsel %vm79_vm12, 1.0, %v4556_v5  ;;  %vm4816_vm13 = vmpackc.low %vm79_vm12, %vm78_vm11  ;;  %v4558_v34 = vmov 0.0|0.0  }
  0x22   :  { %v198_v50 = vld [vmem:[%s197_s16] sm:$0x1]  ;;  %v236_v51 = vrot.slane %v195_v46, 6  ;;  %v4771_v62 = vadd.f32 %v274_v44, %v266_v58  ;;  %s203_s21 = scalar_lea.vmem %s5555_s4, %s4747_s25  ;;  %s206_s22 = scalar_lea.vmem %s5555_s4, %s4757_s29  ;;  %4316 = vrot.lane.b32.xlu0 %v4802_v12, %s4557_s27  ;;  %v4824_v27 = vpack.i.bf16 %v4814_v24, %v4810_v22  ;;  %4080 = vmatprep.subr.bf16.mxu0 %v4558_v34  ;;  %vm1707_vm8 = vcmask 523264  }
  0x23   :  { %v239_v54 = vrot.slane %v198_v50, 5  ;;  %v267_v56 = vsel %vm253_vm1, %v189_v37, %v233_v48  ;;  %v201_v0 = vld [vmem:[%s200_s20] sm:$0x1]  ;;  %s209_s23 = scalar_lea.vmem %s5555_s4, %s4760_s24  ;;  %4088 = vmatprep.subr.bf16.mxu1 %v4558_v34  ;;  %s4561_s24 = smov 8   ;;  %vm106_vm1 = vcmask 64512  }
  0x24   :  { %v268_v59 = vsel %vm255_vm2, %v267_v56, %v236_v51  ;;  %v204_v3 = vld [vmem:[%s203_s21] sm:$0x1]  ;;  %v242_v4 = vrot.slane %v201_v0, 4  ;;  %3737 = vmatprep.mubr.msk.f32.mxu1 %vm288_vm0, %v4771_v62  ;;  %vm109_vm2 = vcmask 130048  }
  0x25   :  { %v269_v1 = vsel %vm257_vm3, %v268_v59, %v239_v54  ;;  %v207_v10 = vld [vmem:[%s206_s22] sm:$0x1]  ;;  %v245_v11 = vrot.slane %v204_v3, 3  ;;  %vm112_vm3 = vcmask 195584  }
  0x26   :  { %v210_v15 = vld [vmem:[%s209_s23] sm:$0x1]  ;;  %v248_v16 = vrot.slane %v207_v10, 2  ;;  %v270_v17 = vsel %vm259_vm4, %v269_v1, %v242_v4  ;;  %4321 = vrot.lane.b32.xlu0 %v4824_v27, %s4557_s27 }
  0x27   :  { %v251_v19 = vrot.slane %v210_v15, 1  ;;  %v271_v20 = vsel %vm261_vm5, %v270_v17, %v245_v11  ;;  %v4833_v28 = vld [vmem:[%s5558_s7 + $0x20] ss:$0 sm:$0xff]  ;;  %s4559_s7 = smov 96  }
  0x28   :  { %v272_v21 = vsel %vm263_vm6, %v271_v20, %v248_v16  ;;  %v3422_v35 = vld [vmem:[%s5556_s5 + $0x20] ss:$0 sm:$0xff] }
  0x29   :  { %v273_v23 = vsel %vm265_vm7, %v272_v21, %v251_v19  ;;  %v84_v56 = vld [vmem:[%s5553_s2] sm:$0xff]  ;;  %s4564_s2 = smov 64  }
  0x2a   :  { %v4820_v26 = vadd.f32 %v274_v44, %v273_v23 }
  0x2c   :  { %3738 = vmatmul.mubr.msk.f32.vlgmr.msra.gmra.mrb[0].mxu1 %vm288_vm0, %v4820_v26 }
  0x2d   :  { %3759 = vmatprep.mubr.msk.f32.mxu1 %vm4560_vm14, %v4556_v5 }
  0x94   :  { %v4317_v32 = vpop.permute.xlu0 %4316 }
  0x95   :  { %v4845_v36 = vunpack.i.h.bf16 %v4317_v32  ;;  %v4847_v37 = vunpack.i.l.bf16 %v4317_v32 }
  0x98   :  { %v4322_v33 = vpop.permute.xlu0 %4321 }
  0x99   :  { %v4849_v39 = vunpack.i.h.bf16 %v4322_v33  ;;  %v4851_v40 = vunpack.i.l.bf16 %v4322_v33 }
  0xee   :  { %v3728_v29 = vpop.f32.mrb[0].mxu0 }
  0xef   :  { %v4836_v30 = vadd.f32 %v3728_v29, %v4833_v28  ;;  %v4838_v31 = vpop.f32.mrb[1].mxu0 }
  0xff   :  { %v3739_v38 = vpop.f32.mrb[0].mxu1 }
 0x100   :  { %v452_v41 = vpop.f32.mrb[1].mxu1  ;;  %v4853_v42 = vadd.f32 %v3739_v38, %v3422_v35 }
 0x101   :  { %v4855_v43 = vadd.f32 %v3422_v35, %v452_v41 }
 0x102   :  { %v481_v50 = vmul.f32 %v4847_v37, %v4853_v42  ;;  %v482_v51 = vmul.f32 %v4845_v36, %v4853_v42  ;;  %v483_v53 = vmul.f32 %v4851_v40, %v4853_v42  ;;  %v484_v54 = vmul.f32 %v4849_v39, %v4853_v42 }
 0x103   :  { %v479_v44 = vmul.f32 %v4851_v40, %v4855_v43  ;;  %v480_v45 = vmul.f32 %v4849_v39, %v4855_v43  ;;  %v477_v46 = vmul.f32 %v4847_v37, %v4855_v43  ;;  %v478_v47 = vmul.f32 %v4845_v36, %v4855_v43 }
 0x104   :  { %v4330_v52 = vpack.i.bf16 %v482_v51, %v481_v50  ;;  %v4340_v55 = vpack.i.bf16 %v484_v54, %v483_v53  ;;  %v4565_v53 = vmov 1.0|1.0  }
 0x105   :  { %v4335_v48 = vpack.i.bf16 %v480_v45, %v479_v44  ;;  %v4325_v49 = vpack.i.bf16 %v478_v47, %v477_v46 }
 0x107   :  { %4336 = vrot.lane.b32.xlu0 %v4335_v48, %s4559_s7  ;;  %4326 = vrot.lane.b32.xlu1 %v4325_v49, %s4559_s7 }
 0x10b   :  { %4331 = vrot.lane.b32.xlu1 %v4330_v52, %s4559_s7  ;;  %88 = vrot.lane.b32.xlu0 %v84_v56, %s4561_s24 }
 0x10f   :  { %4341 = vrot.lane.b32.xlu1 %v4340_v55, %s4559_s7  ;;  %94 = vrot.lane.b32.xlu0 %v84_v56, %s4562_s12 }
 0x113   :  { %90 = vrot.lane.b32.xlu1 %v85_v57, %s4561_s24  ;;  %100 = vrot.lane.b32.xlu0 %v84_v56, %s4563_s17 }
 0x117   :  { %96 = vrot.lane.b32.xlu1 %v85_v57, %s4562_s12 }
 0x11b   :  { %102 = vrot.lane.b32.xlu1 %v85_v57, %s4563_s17 }
 0x179   :  { %v4327_v58 = vpop.permute.xlu1 %4326  ;;  %v4337_v0 = vpop.permute.xlu0 %4336 }
 0x17a   :  { %v4329_v59 = vunpack.i.h.bf16 %v4327_v58  ;;  %v4328_v60 = vunpack.i.l.bf16 %v4327_v58  ;;  %v4339_v4 = vunpack.i.h.bf16 %v4337_v0  ;;  %v4338_v9 = vunpack.i.l.bf16 %v4337_v0 }
 0x17c   :  { %v4081_v63 = vpack.c.bf16 %v4329_v59, %v4328_v60  ;;  %v4085_v13 = vpack.c.bf16 %v4339_v4, %v4338_v9 }
 0x17d   :  { %v4332_v1 = vpop.permute.xlu1 %4331  ;;  %v89_v18 = vpop.permute.xlu0 %88 }
 0x17e   :  { %v4334_v2 = vunpack.i.h.bf16 %v4332_v1  ;;  %v4333_v3 = vunpack.i.l.bf16 %v4332_v1  ;;  %4083 = vmatpush3.bf16.xpose.msk.msra.mxu0 %vm4895_vm15, %v4081_v63  ;;  %v107_v21 = vsel %vm106_vm1, %v84_v56, %v89_v18 }
 0x17f   :  { %4084 = vmatprep.subr.bf16.mxu0 %v4558_v34 }
 0x180   :  { %v4089_v10 = vpack.c.bf16 %v4334_v2, %v4333_v3 }
 0x181   :  { %v4342_v11 = vpop.permute.xlu1 %4341  ;;  %v95_v20 = vpop.permute.xlu0 %94 }
 0x182   :  { %4091 = vmatpush3.bf16.xpose.msk.msra.mxu1 %vm4895_vm15, %v4089_v10  ;;  %v4344_v15 = vunpack.i.h.bf16 %v4342_v11  ;;  %v4343_v16 = vunpack.i.l.bf16 %v4342_v11  ;;  %v110_v29 = vsel %vm109_vm2, %v107_v21, %v95_v20 }
 0x183   :  { %4092 = vmatprep.subr.bf16.mxu1 %v4558_v34 }
 0x184   :  { %v4093_v17 = vpack.c.bf16 %v4344_v15, %v4343_v16 }
 0x185   :  { %v91_v19 = vpop.permute.xlu1 %90  ;;  %v101_v32 = vpop.permute.xlu0 %100 }
 0x186   :  { %4087 = vmatpush3.bf16.xpose.msk.msra.mxu0 %vm4895_vm15, %v4085_v13  ;;  %v108_v33 = vsel %vm106_vm1, %v85_v57, %v91_v19  ;;  %v4920_v35 = vsel %vm112_vm3, %v110_v29, %v101_v32 }
 0x187   :  { %vm115_vm4 = vcmp.gt.f32.partialorder %v4920_v35, 0.5  ;;  %4097 = vmatprep.subr.msk.bf16.mxu0 %vm4791_vm10, %v4565_v53 }
 0x189   :  { %v97_v23 = vpop.permute.xlu1 %96 }
 0x18a   :  { %4095 = vmatpush3.bf16.xpose.msk.msra.mxu1 %vm4895_vm15, %v4093_v17  ;;  %v111_v38 = vsel %vm109_vm2, %v108_v33, %v97_v23 }
 0x18b   :  { %4104 = vmatprep.subr.bf16.mxu1 %v4558_v34 }
 0x18d   :  { %3749 = vmatmul.mubr.msk.f32.vlgmr.msra.gmra.mrb[2].mxu0 %vm288_vm0, %v4855_v43  ;;  %v103_v41 = vpop.permute.xlu1 %102 }
 0x18e   :  { %v4927_v47 = vsel %vm112_vm3, %v111_v38, %v103_v41  ;;  %4099 = vmatpush3.bf16.msk.msra.mxu0 %vm4791_vm10, %v4565_v53 }
 0x18f   :  { %vm116_vm5 = vcmp.gt.f32.partialorder %v4927_v47, 0.5  ;;  %4101 = vmatprep.subr.msk.bf16.mxu0 %vm4816_vm13, %v4565_v53 }
 0x191   :  { %3760 = vmatmul.mubr.msk.f32.vlgmr.msra.gmra.mrb[2].mxu1 %vm288_vm0, %v4853_v42 }
 0x192   :  { %3781 = vmatprep.mubr.msk.f32.mxu1 %vm4560_vm14, %v4556_v5  ;;  %4103 = vmatpush3.bf16.msk.msra.mxu0 %vm4816_vm13, %v4565_v53 }
 0x193   :  { %4110 = vmatprep.subr.bf16.mxu0 %v4558_v34 }
 0x260   :  { %v594_v44 = vpop.f32.mrb[2].mxu0 }
 0x261   :  { %v691_v45 = vsel %vm115_vm4, 1e-10, %v594_v44  ;;  %v3750_v46 = vpop.f32.mrb[3].mxu0 }
 0x262   :  { %v693_v48 = vsel %vm288_vm0, %v691_v45, -inf }
 0x263   :  { %694 = vmax.xlane.f32.xlu0 %v693_v48 }
 0x264   :  { %v687_v49 = vpop.f32.mrb[2].mxu1 }
 0x265   :  { %v692_v50 = vsel %vm116_vm5, 1e-10, %v687_v49  ;;  %v3761_v51 = vpop.f32.mrb[3].mxu1 }
 0x266   :  { %v696_v52 = vsel %vm288_vm0, %v692_v50, -inf }
 0x267   :  { %697 = vmax.xlane.f32.xlu1 %v696_v52 }
 0x278   :  { %4351 = vrot.lane.b32.xlu1 %v4824_v27, %s4564_s2 }
 0x279   :  { %4346 = vrot.lane.b32.xlu0 %v4802_v12, %s4564_s2 }
 0x2f0   :  { %v695_v54 = vpop.xlane.xlu0 %694 }
 0x2f1   :  { %v699_v55 = vsub.f32 %v691_v45, %v695_v54 }
 0x2f3   :  { %v701_v56 = vmul.f32 1.442695, %v699_v55 }
 0x2f4   :  { %v698_v57 = vpop.xlane.xlu1 %697  ;;  %v4347_v58 = vpop.permute.xlu0 %4346 }
 0x2f5   :  { %4485 = vpow2.f32 %v701_v56  ;;  %v700_v59 = vsub.f32 %v692_v50, %v698_v57  ;;  %v4951_v60 = vunpack.i.h.bf16 %v4347_v58  ;;  %v4953_v63 = vunpack.i.l.bf16 %v4347_v58 }
 0x2f6   :  { %v4988_v58 = vadd.f32 %v4833_v28, %v4838_v31 }
 0x2f7   :  { %v703_v0 = vmul.f32 1.442695, %v700_v59  ;;  %v501_v1 = vmul.f32 %v4953_v63, %v4853_v42  ;;  %v502_v2 = vmul.f32 %v4951_v60, %v4853_v42  ;;  %v497_v3 = vmul.f32 %v4953_v63, %v4855_v43 }
 0x2f8   :  { %v4352_v4 = vpop.permute.xlu1 %4351  ;;  %v498_v9 = vmul.f32 %v4951_v60, %v4855_v43  ;;  %v1099_v59 = vmul.f32 %v4988_v58, %v4786_v6  ;;  %v1101_v28 = vmul.f32 %v4988_v58, %v4810_v22  ;;  %v1102_v31 = vmul.f32 %v4988_v58, %v4814_v24 }
 0x2f9   :  { %4487 = vpow2.f32 %v703_v0  ;;  %v4963_v10 = vunpack.i.h.bf16 %v4352_v4  ;;  %v4965_v11 = vunpack.i.l.bf16 %v4352_v4  ;;  %v4360_v13 = vpack.i.bf16 %v502_v2, %v501_v1 }
 0x2fa   :  { %v4355_v15 = vpack.i.bf16 %v498_v9, %v497_v3  ;;  %v1100_v0 = vmul.f32 %v4988_v58, %v4789_v7 }
 0x2fb   :  { %4361 = vrot.lane.b32.xlu1 %v4360_v13, %s4564_s2  ;;  %v503_v16 = vmul.f32 %v4965_v11, %v4853_v42  ;;  %v504_v17 = vmul.f32 %v4963_v10, %v4853_v42  ;;  %v499_v18 = vmul.f32 %v4965_v11, %v4855_v43  ;;  %v500_v19 = vmul.f32 %v4963_v10, %v4855_v43 }
 0x2fc   :  { %4356 = vrot.lane.b32.xlu0 %v4355_v15, %s4564_s2  ;;  %v4125_v9 = vpack.c.bf16 %v1100_v0, %v1099_v59  ;;  %v4129_v13 = vpack.c.bf16 %v1102_v31, %v1101_v28  ;;  %v5030_v0 = vsub.s32 0, %v4686_v14 }
 0x2fd   :  { %v4370_v20 = vpack.i.bf16 %v504_v17, %v503_v16  ;;  %v4365_v21 = vpack.i.bf16 %v500_v19, %v499_v18 }
 0x2ff   :  { %v4486_v23 = vpop.eup %4485  ;;  %4371 = vrot.lane.b32.xlu1 %v4370_v20, %s4564_s2 }
 0x300   :  { %4366 = vrot.lane.b32.xlu0 %v4365_v21, %s4564_s2  ;;  %3770 = vmatprep.mubr.msk.f32.mxu0 %vm288_vm0, %v4486_v23 }
 0x303   :  { %v4488_v29 = vpop.eup %4487 }
 0x304   :  { %3771 = vmatmul.mubr.msk.f32.vlgmr.msra.gmra.mrb[4].mxu0 %vm288_vm0, %v4488_v29 }
 0x305   :  { %3792 = vmatprep.mubr.msk.f32.mxu0 %vm4560_vm14, %v4556_v5 }
 0x36d   :  { %v4362_v42 = vpop.permute.xlu1 %4361 }
 0x36e   :  { %v4364_v32 = vunpack.i.h.bf16 %v4362_v42  ;;  %v4363_v43 = vunpack.i.l.bf16 %v4362_v42  ;;  %v4357_v33 = vpop.permute.xlu0 %4356 }
 0x36f   :  { %v4359_v38 = vunpack.i.h.bf16 %v4357_v33  ;;  %v4358_v41 = vunpack.i.l.bf16 %v4357_v33 }
 0x370   :  { %v4111_v44 = vpack.c.bf16 %v4364_v32, %v4363_v43 }
 0x371   :  { %v4105_v45 = vpack.c.bf16 %v4359_v38, %v4358_v41  ;;  %v4372_v46 = vpop.permute.xlu1 %4371 }
 0x372   :  { %v4374_v48 = vunpack.i.h.bf16 %v4372_v46  ;;  %v4373_v49 = vunpack.i.l.bf16 %v4372_v46  ;;  %v4367_v50 = vpop.permute.xlu0 %4366  ;;  %4112 = vmatpush3.bf16.msra.mxu0 %v4111_v44  ;;  %v1010_v46 = vld [vmem:[%s5557_s6 + $0x8] sm:$0xff] }
 0x373   :  { %v4369_v51 = vunpack.i.h.bf16 %v4367_v50  ;;  %v4368_v52 = vunpack.i.l.bf16 %v4367_v50  ;;  %4106 = vmatpush3.bf16.msra.mxu1 %v4105_v45  ;;  %4113 = vmatprep.subr.bf16.mxu0 %v4558_v34  ;;  %v1009_v45 = vld [vmem:[%s5557_s6] sm:$0xff]  ;;  %v1012_v50 = vld [vmem:[%s5557_s6 + $0x18] sm:$0xff] }
 0x374   :  { %v4114_v54 = vpack.c.bf16 %v4374_v48, %v4373_v49  ;;  %4107 = vmatprep.subr.bf16.mxu1 %v4558_v34  ;;  %v4116_v48 = vpack.c.bf16 %v1010_v46, %v1009_v45  ;;  %v1011_v49 = vld [vmem:[%s5557_s6 + $0x10] sm:$0xff] }
 0x375   :  { %v4108_v55 = vpack.c.bf16 %v4369_v51, %v4368_v52  ;;  %v4120_v51 = vpack.c.bf16 %v1012_v50, %v1011_v49 }
 0x376   :  { %4115 = vmatpush3.bf16.msra.mxu0 %v4114_v54 }
 0x377   :  { %4109 = vmatpush3.bf16.msra.mxu1 %v4108_v55  ;;  %4124 = vmatprep.subr.bf16.mxu0 %v4558_v34 }
 0x378   :  { %4117 = vmatprep.subr.bf16.mxu1 %v4116_v48 }
 0x3d7   :  { %v3772_v56 = vpop.f32.mrb[4].mxu0 }
 0x3d8   :  { %4489 = vrcp.f32 %v3772_v56  ;;  %v777_v57 = vpop.f32.mrb[5].mxu0 }
 0x3d9   :  { %4491 = vrcp.f32 %v777_v57 }
 0x3e2   :  { %v4490_v1 = vpop.eup %4489 }
 0x3e3   :  { %v4492_v2 = vpop.eup %4491  ;;  %v789_v3 = vmul.f32 %v4490_v1, %v4488_v29  ;;  %v5035_v1 = vld [vmem:[%s5559_s8] sm:$0x3f] }
 0x3e4   :  { %v788_v4 = vmul.f32 %v4492_v2, %v4486_v23  ;;  %v1005_v2 = vsub.s32 1, %v4686_v14 }
 0x3e5   :  { %3793 = vmatmul.mubr.msk.f32.vlgmr.msra.gmra.mrb[6].mxu0 %vm288_vm0, %v789_v3  ;;  %v1000_v3 = vrot.slane %v5035_v1, %v5030_v0 }
 0x3e6   :  { %4127 = vmatpush3.bf16.xpose.msk.msra.mxu0 %vm4895_vm15, %v4125_v9  ;;  %3782 = vmatmul.mubr.msk.f32.vlgmr.msra.gmra.mrb[4].mxu1 %vm288_vm0, %v788_v4  ;;  %v1006_v28 = vrot.slane %v5035_v1, %v1005_v2 }
 0x3e7   :  { %4128 = vmatprep.subr.bf16.mxu0 %v4558_v34  ;;  %3814 = vmatprep.mubr.msk.f32.mxu0 %vm4560_vm14, %v4556_v5 }
 0x3e8   :  { %4119 = vmatpush3.bf16.msra.mxu1 %v4116_v48 }
 0x3e9   :  { %4121 = vmatprep.subr.bf16.mxu1 %v4120_v51 }
 0x3ec   :  { %4123 = vmatpush3.bf16.msra.mxu1 %v4120_v51 }
 0x3ed   :  { %4132 = vmatprep.subr.bf16.mxu1 %v4558_v34 }
 0x3ee   :  { %4131 = vmatpush3.bf16.xpose.msk.msra.mxu0 %vm4895_vm15, %v4129_v13 }
 0x3ef   :  { %4141 = vmatprep.subr.msk.bf16.mxu0 %vm4791_vm10, %v4565_v53 }
 0x4b8   :  { %v964_v15 = vpop.f32.mrb[6].mxu0 }
 0x4b9   :  { %v969_v16 = vadd.f32 %v964_v15, %v4820_v26  ;;  %v875_v17 = vpop.f32.mrb[4].mxu1  ;;  %v3794_v18 = vpop.f32.mrb[7].mxu0 }
 0x4ba   :  { %v968_v19 = vadd.f32 %v875_v17, %v4771_v62  ;;  %v3783_v20 = vpop.f32.mrb[5].mxu1  ;;  %v1103_v17 = vmul.f32 %v4836_v30, %v4786_v6  ;;  %v1104_v18 = vmul.f32 %v4836_v30, %v4789_v7  ;;  %v1105_v6 = vmul.f32 %v4836_v30, %v4810_v22 }
 0x4bb   :  { %v973_v21 = vsel %vm288_vm0, %v969_v16, 0.0  ;;  %v1106_v7 = vmul.f32 %v4836_v30, %v4814_v24  ;;  %v3443_v24 = vld [vmem:[%s5557_s6 + $0x20] ss:$0 sm:$0xff] }
 0x4bc   :  { %974 = vadd.xlane.f32.xlu1 %v973_v21  ;;  %v970_v23 = vsel %vm288_vm0, %v968_v19, 0.0  ;;  %v4133_v21 = vpack.c.bf16 %v1104_v18, %v1103_v17 }
 0x4bd   :  { %971 = vadd.xlane.f32.xlu0 %v970_v23  ;;  %v4137_v23 = vpack.c.bf16 %v1106_v7, %v1105_v6  ;;  %v1113_v7 = vmul.f32 %v4851_v40, %v4836_v30 }
 0x549   :  { %v975_v29 = vpop.xlane.xlu1 %974 }
 0x54a   :  { %v978_v42 = vmul.f32 0.03125, %v975_v29  ;;  %v972_v32 = vpop.xlane.xlu0 %971  ;;  %v117_v29 = vld [vmem:[%s5554_s3] sm:$0x1] }
 0x54b   :  { %v977_v43 = vmul.f32 0.03125, %v972_v32  ;;  %v124_v32 = vrot.slane %v117_v29, %v5030_v0 }
 0x54c   :  { %v980_v33 = vsub.f32 %v969_v16, %v978_v42  ;;  %v118_v42 = vld [vmem:[%s5554_s3 + $0x1] sm:$0x1] }
 0x54d   :  { %v979_v38 = vsub.f32 %v968_v19, %v977_v43  ;;  %v128_v22 = vrot.slane %v118_v42, %v5030_v0  ;;  %129 = vrot.lane.b32.xlu1 %v124_v32, %s4561_s24 }
 0x54e   :  { %v982_v44 = vmul.f32 %v980_v33, %v980_v33 }
 0x54f   :  { %v981_v41 = vmul.f32 %v979_v38, %v979_v38 }
 0x550   :  { %v986_v62 = vsel %vm288_vm0, %v982_v44, 0.0 }
 0x551   :  { %v983_v26 = vsel %vm288_vm0, %v981_v41, 0.0  ;;  %135 = vrot.lane.b32.xlu1 %v124_v32, %s4562_s12 }
 0x552   :  { %984 = vadd.xlane.f32.xlu0 %v983_v26 }
 0x555   :  { %137 = vrot.lane.b32.xlu1 %v128_v22, %s4562_s12 }
 0x556   :  { %987 = vadd.xlane.f32.xlu0 %v986_v62 }
 0x559   :  { %143 = vrot.lane.b32.xlu1 %v128_v22, %s4563_s17 }
 0x56c   :  { %131 = vrot.lane.b32.xlu0 %v128_v22, %s4561_s24 }
 0x570   :  { %141 = vrot.lane.b32.xlu0 %v124_v32, %s4563_s17 }
 0x5bf   :  { %v130_v26 = vpop.permute.xlu1 %129 }
 0x5c0   :  { %v147_v48 = vsel %vm106_vm1, %v117_v29, %v130_v26  ;;  %v1107_v29 = vmul.f32 %v4847_v37, %v4988_v58 }
 0x5c3   :  { %v136_v44 = vpop.permute.xlu1 %135 }
 0x5c4   :  { %v149_v51 = vsel %vm109_vm2, %v147_v48, %v136_v44 }
 0x5c7   :  { %v138_v62 = vpop.permute.xlu1 %137 }
 0x5cb   :  { %v144_v50 = vpop.permute.xlu1 %143 }
 0x5df   :  { %v985_v52 = vpop.xlane.xlu0 %984 }
 0x5e0   :  { %v989_v54 = vmul.f32 0.03125, %v985_v52 }
 0x5e2   :  { %v991_v55 = vadd.f32 1e-05, %v989_v54 }
 0x5e3   :  { %v988_v56 = vpop.xlane.xlu0 %987 }
 0x5e4   :  { %4493 = vrsqrt.f32 %v991_v55  ;;  %v990_v57 = vmul.f32 0.03125, %v988_v56 }
 0x5e6   :  { %v992_v59 = vadd.f32 1e-05, %v990_v57 }
 0x5e7   :  { %v132_v45 = vpop.permute.xlu0 %131 }
 0x5e8   :  { %4495 = vrsqrt.f32 %v992_v59  ;;  %v148_v46 = vsel %vm106_vm1, %v118_v42, %v132_v45  ;;  %v1108_v42 = vmul.f32 %v4845_v36, %v4988_v58 }
 0x5e9   :  { %v150_v49 = vsel %vm109_vm2, %v148_v46, %v138_v62 }
 0x5ea   :  { %v152_v54 = vsel %vm112_vm3, %v150_v49, %v144_v50  ;;  %v4375_v22 = vpack.i.bf16 %v1108_v42, %v1107_v29 }
 0x5eb   :  { %v142_v52 = vpop.permute.xlu0 %141  ;;  %v160_v56 = vrot.slane %v152_v54, %v5030_v0 }
 0x5ec   :  { %v151_v55 = vsel %vm112_vm3, %v149_v51, %v142_v52 }
 0x5ed   :  { %v156_v57 = vrot.slane %v151_v55, %v5030_v0  ;;  %vm5106_vm6 = vcmp.gt.f32.partialorder %v160_v56, 0.5 }
 0x5ee   :  { %v4494_v4 = vpop.eup %4493 }
 0x5ef   :  { %v995_v9 = vmul.f32 %v4494_v4, %v979_v38  ;;  %vm5112_vm7 = vcmp.gt.f32.partialorder %v156_v57, 0.5 }
 0x5f1   :  { %v1001_v31 = vmul.f32 %v1000_v3, %v995_v9 }
 0x5f2   :  { %v4496_v13 = vpop.eup %4495 }
 0x5f3   :  { %v996_v15 = vmul.f32 %v4496_v13, %v980_v33  ;;  %v5043_v16 = vadd.f32 %v1006_v28, %v1001_v31 }
 0x5f5   :  { %v1002_v19 = vmul.f32 %v1000_v3, %v996_v15  ;;  %3803 = vmatprep.mubr.msk.f32.mxu1 %vm288_vm0, %v5043_v16 }
 0x5f7   :  { %v5051_v20 = vadd.f32 %v1006_v28, %v1002_v19  ;;  %v1111_v19 = vmul.f32 %v4847_v37, %v4836_v30 }
 0x5f9   :  { %3804 = vmatmul.mubr.msk.f32.vlgmr.msra.gmra.mrb[6].mxu1 %vm288_vm0, %v5051_v20 }
 0x5fa   :  { %4135 = vmatpush3.bf16.xpose.msk.msra.mxu1 %vm4895_vm15, %v4133_v21  ;;  %3825 = vmatprep.mubr.msk.f32.mxu1 %vm4560_vm14, %v4556_v5  ;;  %v1112_v21 = vmul.f32 %v4845_v36, %v4836_v30 }
 0x5fb   :  { %4136 = vmatprep.subr.bf16.mxu1 %v4558_v34 }
 0x5fc   :  { %v4380_v6 = vpack.i.bf16 %v1112_v21, %v1111_v19 }
 0x602   :  { %4139 = vmatpush3.bf16.xpose.msk.msra.mxu1 %vm4895_vm15, %v4137_v23  ;;  %v1114_v23 = vmul.f32 %v4849_v39, %v4836_v30 }
 0x603   :  { %4148 = vmatprep.subr.bf16.mxu1 %v4558_v34 }
 0x604   :  { %v4390_v32 = vpack.i.bf16 %v1114_v23, %v1113_v7 }
 0x6cc   :  { %v3805_v43 = vpop.f32.mrb[6].mxu1 }
 0x6cd   :  { %v1096_v33 = vadd.f32 %v3805_v43, %v3443_v24  ;;  %v1090_v38 = vpop.f32.mrb[7].mxu1  ;;  %v1110_v43 = vmul.f32 %v4849_v39, %v4988_v58 }
 0x6ce   :  { %v1091_v41 = vadd.f32 %v3443_v24, %v1090_v38  ;;  %v1109_v24 = vmul.f32 %v4851_v40, %v4988_v58 }
 0x6cf   :  { %3826 = vmatmul.mubr.msk.f32.vlgmr.msra.gmra.mrb[8].mxu1 %vm288_vm0, %v1096_v33 }
 0x6d0   :  { %3815 = vmatmul.mubr.msk.f32.vlgmr.msra.gmra.mrb[8].mxu0 %vm288_vm0, %v1091_v41  ;;  %3847 = vmatprep.mubr.msk.f32.mxu1 %vm4560_vm14, %v4556_v5  ;;  %v4385_v33 = vpack.i.bf16 %v1110_v43, %v1109_v24 }
 0x6d1   :  { %4143 = vmatpush3.bf16.msk.msra.mxu0 %vm4791_vm10, %v4565_v53 }
 0x6d2   :  { %4145 = vmatprep.subr.msk.bf16.mxu0 %vm4816_vm13, %v4565_v53 }
 0x6d5   :  { %4147 = vmatpush3.bf16.msk.msra.mxu0 %vm4816_vm13, %v4565_v53 }
 0x6d6   :  { %4154 = vmatprep.subr.bf16.mxu0 %v4558_v34 }
 0x7a2   :  { %v1281_v3 = vpop.f32.mrb[8].mxu1 }
 0x7a3   :  { %v1286_v4 = vsel %vm5106_vm6, 1e-10, %v1281_v3  ;;  %v1196_v28 = vpop.f32.mrb[8].mxu0  ;;  %v3827_v31 = vpop.f32.mrb[9].mxu1 }
 0x7a4   :  { %v1285_v13 = vsel %vm5112_vm7, 1e-10, %v1196_v28  ;;  %v3816_v15 = vpop.f32.mrb[9].mxu0  ;;  %v1290_v17 = vsel %vm288_vm0, %v1286_v4, -inf }
 0x7a5   :  { %1291 = vmax.xlane.f32.xlu1 %v1290_v17  ;;  %v1287_v18 = vsel %vm288_vm0, %v1285_v13, -inf }
 0x7a6   :  { %1288 = vmax.xlane.f32.xlu0 %v1287_v18 }
 0x7b6   :  { %4381 = vrot.lane.b32.xlu1 %v4380_v6, %s4559_s7 }
 0x7ba   :  { %4391 = vrot.lane.b32.xlu1 %v4390_v32, %s4559_s7 }
 0x7bc   :  { %4376 = vrot.lane.b32.xlu0 %v4375_v22, %s4559_s7 }
 0x7c0   :  { %4386 = vrot.lane.b32.xlu0 %v4385_v33, %s4559_s7 }
 0x832   :  { %v1292_v38 = vpop.xlane.xlu1 %1291 }
 0x833   :  { %v1294_v41 = vsub.f32 %v1286_v4, %v1292_v38  ;;  %v1289_v26 = vpop.xlane.xlu0 %1288 }
 0x834   :  { %v1293_v44 = vsub.f32 %v1285_v13, %v1289_v26 }
 0x835   :  { %v1297_v62 = vmul.f32 1.442695, %v1294_v41 }
 0x836   :  { %v1295_v45 = vmul.f32 1.442695, %v1293_v44  ;;  %v4382_v50 = vpop.permute.xlu1 %4381 }
 0x837   :  { %v4377_v46 = vpop.permute.xlu0 %4376  ;;  %v4384_v57 = vunpack.i.h.bf16 %v4382_v50  ;;  %v4383_v3 = vunpack.i.l.bf16 %v4382_v50 }
 0x838   :  { %4497 = vpow2.f32 %v1295_v45  ;;  %v4379_v48 = vunpack.i.h.bf16 %v4377_v46  ;;  %v4378_v49 = vunpack.i.l.bf16 %v4377_v46 }
 0x839   :  { %4499 = vpow2.f32 %v1297_v62  ;;  %v4155_v13 = vpack.c.bf16 %v4384_v57, %v4383_v3  ;;  %v1607_v3 = vld [vmem:[%s5561_s10] sm:$0xff] }
 0x83a   :  { %v4149_v51 = vpack.c.bf16 %v4379_v48, %v4378_v49  ;;  %v4392_v4 = vpop.permute.xlu1 %4391 }
 0x83b   :  { %v4387_v52 = vpop.permute.xlu0 %4386  ;;  %v4394_v15 = vunpack.i.h.bf16 %v4392_v4  ;;  %v4393_v17 = vunpack.i.l.bf16 %v4392_v4  ;;  %v1608_v4 = vld [vmem:[%s5561_s10 + $0x8] sm:$0xff] }
 0x83c   :  { %v4389_v54 = vunpack.i.h.bf16 %v4387_v52  ;;  %v4388_v55 = vunpack.i.l.bf16 %v4387_v52  ;;  %4150 = vmatpush3.bf16.msra.mxu1 %v4149_v51  ;;  %v1602_v51 = vld [vmem:[%s5560_s9] sm:$0xff]  ;;  %v1603_v52 = vld [vmem:[%s5560_s9 + $0x8] sm:$0xff] }
 0x83d   :  { %4151 = vmatprep.subr.bf16.mxu1 %v4558_v34  ;;  %v4158_v18 = vpack.c.bf16 %v4394_v15, %v4393_v17  ;;  %v1611_v17 = vld [vmem:[%s5561_s10 + $0x20] sm:$0xff] }
 0x83e   :  { %v4152_v56 = vpack.c.bf16 %v4389_v54, %v4388_v55  ;;  %v4160_v54 = vpack.c.bf16 %v1603_v52, %v1602_v51  ;;  %v1604_v55 = vld [vmem:[%s5560_s9 + $0x10] sm:$0xff] }
 0x840   :  { %4153 = vmatpush3.bf16.msra.mxu1 %v4152_v56  ;;  %v1605_v56 = vld [vmem:[%s5560_s9 + $0x18] sm:$0xff] }
 0x841   :  { %4161 = vmatprep.subr.bf16.mxu1 %v4160_v54  ;;  %v4164_v57 = vpack.c.bf16 %v1605_v56, %v1604_v55 }
 0x842   :  { %v4498_v28 = vpop.eup %4497 }
 0x843   :  { %v4500_v31 = vpop.eup %4499  ;;  %3836 = vmatprep.mubr.msk.f32.mxu0 %vm288_vm0, %v4498_v28 }
 0x844   :  { %3837 = vmatmul.mubr.msk.f32.vlgmr.msra.gmra.mrb[10].mxu0 %vm288_vm0, %v4500_v31 }
 0x845   :  { %4156 = vmatpush3.bf16.msra.mxu0 %v4155_v13  ;;  %3858 = vmatprep.mubr.msk.f32.mxu0 %vm4560_vm14, %v4556_v5  ;;  %v1610_v13 = vld [vmem:[%s5561_s10 + $0x18] sm:$0xff] }
 0x846   :  { %4157 = vmatprep.subr.bf16.mxu0 %v4558_v34 }
 0x849   :  { %4159 = vmatpush3.bf16.msra.mxu0 %v4158_v18  ;;  %v1612_v18 = vld [vmem:[%s5561_s10 + $0x28] sm:$0xff] }
 0x917   :  { %v3838_v19 = vpop.f32.mrb[10].mxu0 }
 0x918   :  { %4501 = vrcp.f32 %v3838_v19  ;;  %v1371_v21 = vpop.f32.mrb[11].mxu0  ;;  %v4176_v19 = vpack.c.bf16 %v1612_v18, %v1611_v17 }
 0x919   :  { %4503 = vrcp.f32 %v1371_v21 }
 0x922   :  { %v4502_v6 = vpop.eup %4501 }
 0x923   :  { %v4504_v7 = vpop.eup %4503  ;;  %v1383_v23 = vmul.f32 %v4502_v6, %v4500_v31  ;;  %v4168_v31 = vpack.c.bf16 %v1608_v4, %v1607_v3 }
 0x924   :  { %v1382_v29 = vmul.f32 %v4504_v7, %v4498_v28  ;;  %v1609_v28 = vld [vmem:[%s5561_s10 + $0x10] sm:$0xff] }
 0x925   :  { %3859 = vmatmul.mubr.msk.f32.vlgmr.msra.gmra.mrb[12].mxu0 %vm288_vm0, %v1383_v23  ;;  %v4172_v15 = vpack.c.bf16 %v1610_v13, %v1609_v28  ;;  %4169 = vmatprep.subr.bf16.mxu0 %v4168_v31 }
 0x926   :  { %3848 = vmatmul.mubr.msk.f32.vlgmr.msra.gmra.mrb[10].mxu1 %vm288_vm0, %v1382_v29  ;;  %4171 = vmatpush3.bf16.msra.mxu0 %v4168_v31 }
 0x927   :  { %4163 = vmatpush3.bf16.msra.mxu1 %v4160_v54  ;;  %4173 = vmatprep.subr.bf16.mxu0 %v4172_v15 }
 0x928   :  { %4165 = vmatprep.subr.bf16.mxu1 %v4164_v57 }
 0x92a   :  { %4175 = vmatpush3.bf16.msra.mxu0 %v4172_v15 }
 0x92b   :  { %4167 = vmatpush3.bf16.msra.mxu1 %v4164_v57  ;;  %4177 = vmatprep.subr.bf16.mxu0 %v4176_v19  ;;  %v3467_v57 = vld [vmem:[%s5561_s10 + $0x40] ss:$0 sm:$0xff] }
 0x92e   :  { %4179 = vmatpush3.bf16.msra.mxu0 %v4176_v19 }
 0x9f8   :  { %v1558_v42 = vpop.f32.mrb[12].mxu0 }
 0x9f9   :  { %v1563_v32 = vadd.f32 %v1558_v42, %v5051_v20  ;;  %v1469_v22 = vpop.f32.mrb[10].mxu1  ;;  %v3860_v24 = vpop.f32.mrb[13].mxu0 }
 0x9fa   :  { %v1562_v43 = vadd.f32 %v1469_v22, %v5043_v16  ;;  %v3849_v33 = vpop.f32.mrb[11].mxu1  ;;  %v1598_v22 = vsub.s32 3, %v4686_v14 }
 0x9fb   :  { %v1567_v38 = vsel %vm288_vm0, %v1563_v32, 0.0 }
 0x9fc   :  { %1568 = vadd.xlane.f32.xlu1 %v1567_v38  ;;  %v1564_v41 = vsel %vm288_vm0, %v1562_v43, 0.0  ;;  %v1599_v38 = vrot.slane %v5035_v1, %v1598_v22 }
 0x9fd   :  { %1565 = vadd.xlane.f32.xlu0 %v1564_v41 }
 0xa89   :  { %v1569_v26 = vpop.xlane.xlu1 %1568 }
 0xa8a   :  { %v1571_v44 = vmul.f32 0.03125, %v1569_v26  ;;  %v1566_v62 = vpop.xlane.xlu0 %1565 }
 0xa8b   :  { %v1570_v45 = vmul.f32 0.03125, %v1566_v62 }
 0xa8c   :  { %v1573_v46 = vsub.f32 %v1563_v32, %v1571_v44  ;;  %v1592_v32 = vsub.s32 2, %v4686_v14 }
 0xa8d   :  { %v1572_v48 = vsub.f32 %v1562_v43, %v1570_v45 }
 0xa8e   :  { %v1575_v50 = vmul.f32 %v1573_v46, %v1573_v46  ;;  %v1593_v24 = vrot.slane %v5035_v1, %v1592_v32 }
 0xa8f   :  { %v1574_v49 = vmul.f32 %v1572_v48, %v1572_v48 }
 0xa90   :  { %v1579_v16 = vsel %vm288_vm0, %v1575_v50, 0.0 }
 0xa91   :  { %v1576_v20 = vsel %vm288_vm0, %v1574_v49, 0.0 }
 0xa92   :  { %1577 = vadd.xlane.f32.xlu0 %v1576_v20  ;;  %v1613_v20 = vld [vmem:[%s5561_s10 + $0x30] sm:$0xff] }
 0xa96   :  { %1580 = vadd.xlane.f32.xlu0 %v1579_v16 }
 0xb1f   :  { %v1578_v21 = vpop.xlane.xlu0 %1577 }
 0xb20   :  { %v1582_v6 = vmul.f32 0.03125, %v1578_v21 }
 0xb22   :  { %v1584_v7 = vadd.f32 1e-05, %v1582_v6 }
 0xb23   :  { %v1581_v23 = vpop.xlane.xlu0 %1580 }
 0xb24   :  { %4505 = vrsqrt.f32 %v1584_v7  ;;  %v1583_v29 = vmul.f32 0.03125, %v1581_v23 }
 0xb26   :  { %v1585_v42 = vadd.f32 1e-05, %v1583_v29 }
 0xb28   :  { %4507 = vrsqrt.f32 %v1585_v42 }
 0xb2e   :  { %v4506_v43 = vpop.eup %4505 }
 0xb2f   :  { %v1588_v33 = vmul.f32 %v4506_v43, %v1572_v48  ;;  %v1614_v48 = vld [vmem:[%s5561_s10 + $0x38] sm:$0xff] }
 0xb30   :  { %v4180_v50 = vpack.c.bf16 %v1614_v48, %v1613_v20 }
 0xb31   :  { %v1594_v41 = vmul.f32 %v1593_v24, %v1588_v33 }
 0xb32   :  { %v4508_v26 = vpop.eup %4507  ;;  %4181 = vmatprep.subr.bf16.mxu0 %v4180_v50 }
 0xb33   :  { %v1589_v44 = vmul.f32 %v4508_v26, %v1573_v46  ;;  %v1600_v62 = vadd.f32 %v1599_v38, %v1594_v41  ;;  %4183 = vmatpush3.bf16.msra.mxu0 %v4180_v50  ;;  %v3464_v46 = vld [vmem:[%s5560_s9 + $0x20] ss:$0 sm:$0xff]  ;;  %v3472_v41 = vld [vmem:[%s5556_s5 + $0x30] sm:$0xff] }
 0xb34   :  { %4200 = vmatprep.subr.bf16.mxu0 %v4558_v34 }
 0xb35   :  { %v1595_v45 = vmul.f32 %v1593_v24, %v1589_v44  ;;  %3869 = vmatprep.mubr.msk.f32.mxu1 %vm288_vm0, %v1600_v62  ;;  %v3473_v44 = vld [vmem:[%s5556_s5 + $0x38] sm:$0xff] }
 0xb37   :  { %v1601_v49 = vadd.f32 %v1599_v38, %v1595_v45  ;;  %v3471_v38 = vld [vmem:[%s5556_s5 + $0x28] sm:$0xff] }
 0xb38   :  { %v4184_v26 = vpack.c.bf16 %v3472_v41, %v3471_v38 }
 0xb39   :  { %3870 = vmatmul.mubr.msk.f32.vlgmr.msra.gmra.mrb[12].mxu1 %vm288_vm0, %v1601_v49 }
 0xb3a   :  { %4185 = vmatprep.subr.bf16.mxu1 %v4184_v26 }
 0xb3b   :  { %4187 = vmatpush3.bf16.msra.mxu1 %v4184_v26 }
 0xc0c   :  { %v3871_v16 = vpop.f32.mrb[12].mxu1 }
 0xc0d   :  { %v1698_v51 = vadd.f32 %v3871_v16, %v3464_v46  ;;  %v1692_v52 = vpop.f32.mrb[13].mxu1 }
 0xc0e   :  { %v1693_v54 = vadd.f32 %v3464_v46, %v1692_v52  ;;  %v1825_v52 = vsub.s32 5, %v4686_v14 }
 0xc0f   :  { %v1702_v56 = vmax.f32 %v1698_v51, 0.0  ;;  %v1819_v51 = vsub.s32 4, %v4686_v14 }
 0xc10   :  { %v1701_v55 = vmax.f32 %v1693_v54, 0.0 }
 0xc11   :  { %v1820_v54 = vrot.slane %v5035_v1, %v1819_v51 }
 0xc12   :  { %3888 = vmatprep.mubr.msk.f32.mxu0 %vm1707_vm8, %v1701_v55 }
 0xc13   :  { %3889 = vmatmul.mubr.msk.f32.vlgmr.msra.gmra.mrb[14].mxu0 %vm1707_vm8, %v1702_v56 }
 0xc14   :  { %3921 = vmatprep.mubr.msk.f32.mxu0 %vm4560_vm14, %v4556_v5 }
 0xce6   :  { %v3890_v3 = vpop.f32.mrb[14].mxu0 }
 0xce7   :  { %v1786_v4 = vadd.f32 %v3890_v3, %v3467_v57  ;;  %v1780_v28 = vpop.f32.mrb[15].mxu0 }
 0xce8   :  { %v1781_v31 = vadd.f32 %v3467_v57, %v1780_v28 }
 0xce9   :  { %v1790_v13 = vadd.f32 %v1786_v4, %v1601_v49  ;;  %v1826_v4 = vrot.slane %v5035_v1, %v1825_v52 }
 0xcea   :  { %v1789_v15 = vadd.f32 %v1781_v31, %v1600_v62  ;;  %v3474_v62 = vld [vmem:[%s5556_s5 + $0x40] sm:$0xff] }
 0xceb   :  { %v1794_v17 = vsel %vm288_vm0, %v1790_v13, 0.0  ;;  %v4188_v45 = vpack.c.bf16 %v3474_v62, %v3473_v44 }
 0xcec   :  { %1795 = vadd.xlane.f32.xlu0 %v1794_v17  ;;  %v1791_v18 = vsel %vm288_vm0, %v1789_v15, 0.0  ;;  %v3476_v17 = vld [vmem:[%s5556_s5 + $0x48] ss:$0 sm:$0xff] }
 0xced   :  { %1792 = vadd.xlane.f32.xlu1 %v1791_v18  ;;  %4189 = vmatprep.subr.bf16.mxu1 %v4188_v45 }
 0xcee   :  { %4191 = vmatpush3.bf16.msra.mxu1 %v4188_v45 }
 0xcef   :  { %4192 = vmatprep.subr.bf16.mxu1 %v4558_v34 }
 0xd79   :  { %v1796_v19 = vpop.xlane.xlu0 %1795 }
 0xd7a   :  { %v1798_v21 = vmul.f32 0.03125, %v1796_v19  ;;  %v1793_v6 = vpop.xlane.xlu1 %1792 }
 0xd7b   :  { %v1797_v7 = vmul.f32 0.03125, %v1793_v6 }
 0xd7c   :  { %v1800_v23 = vsub.f32 %v1790_v13, %v1798_v21 }
 0xd7d   :  { %v1799_v29 = vsub.f32 %v1789_v15, %v1797_v7 }
 0xd7e   :  { %v1802_v42 = vmul.f32 %v1800_v23, %v1800_v23 }
 0xd7f   :  { %v1801_v24 = vmul.f32 %v1799_v29, %v1799_v29 }
 0xd80   :  { %v1806_v43 = vsel %vm288_vm0, %v1802_v42, 0.0 }
 0xd81   :  { %1807 = vadd.xlane.f32.xlu0 %v1806_v43  ;;  %v1803_v33 = vsel %vm288_vm0, %v1801_v24, 0.0 }
 0xd82   :  { %1804 = vadd.xlane.f32.xlu1 %v1803_v33 }
 0xe0e   :  { %v1808_v49 = vpop.xlane.xlu0 %1807 }
 0xe0f   :  { %v1810_v20 = vmul.f32 0.03125, %v1808_v49  ;;  %v1805_v48 = vpop.xlane.xlu1 %1804 }
 0xe10   :  { %v1809_v50 = vmul.f32 0.03125, %v1805_v48 }
 0xe11   :  { %v1812_v46 = vadd.f32 1e-05, %v1810_v20 }
 0xe12   :  { %v1811_v16 = vadd.f32 1e-05, %v1809_v50 }
 0xe13   :  { %4509 = vrsqrt.f32 %v1812_v46 }
 0xe14   :  { %4511 = vrsqrt.f32 %v1811_v16 }
 0xe1d   :  { %v4510_v55 = vpop.eup %4509 }
 0xe1e   :  { %v4512_v56 = vpop.eup %4511  ;;  %v1816_v57 = vmul.f32 %v4510_v55, %v1800_v23 }
 0xe1f   :  { %v1815_v3 = vmul.f32 %v4512_v56, %v1799_v29 }
 0xe20   :  { %v1822_v28 = vmul.f32 %v1820_v54, %v1816_v57 }
 0xe21   :  { %v1821_v31 = vmul.f32 %v1820_v54, %v1815_v3 }
 0xe22   :  { %v5238_v15 = vadd.f32 %v1826_v4, %v1822_v28 }
 0xe23   :  { %v5236_v13 = vadd.f32 %v1826_v4, %v1821_v31 }
 0xe25   :  { %3899 = vmatprep.mubr.msk.f32.mxu1 %vm288_vm0, %v5236_v13 }
 0xe26   :  { %3900 = vmatmul.mubr.msk.f32.vlgmr.msra.gmra.mrb[14].mxu1 %vm288_vm0, %v5238_v15 }
 0xe27   :  { %3910 = vmatprep.mubr.msk.f32.mxu1 %vm4560_vm14, %v4556_v5 }
 0xef9   :  { %v3901_v1 = vpop.f32.mrb[14].mxu1 }
 0xefa   :  { %v5249_v18 = vadd.f32 %v3901_v1, %v3476_v17  ;;  %v1913_v19 = vpop.f32.mrb[15].mxu1 }
 0xefb   :  { %v5251_v21 = vadd.f32 %v3476_v17, %v1913_v19 }
 0xefc   :  { %v1926_v6 = vmul.f32 %v4847_v37, %v5249_v18  ;;  %v1927_v7 = vmul.f32 %v4845_v36, %v5249_v18  ;;  %v1928_v41 = vmul.f32 %v4851_v40, %v5249_v18  ;;  %v1936_v35 = vmul.f32 %v4965_v11, %v5249_v18 }
 0xefd   :  { %v1922_v23 = vmul.f32 %v4847_v37, %v5251_v21  ;;  %v1923_v29 = vmul.f32 %v4845_v36, %v5251_v21  ;;  %v1924_v43 = vmul.f32 %v4851_v40, %v5251_v21  ;;  %v1925_v33 = vmul.f32 %v4849_v39, %v5251_v21 }
 0xefe   :  { %v4400_v42 = vpack.i.bf16 %v1927_v7, %v1926_v6  ;;  %v1929_v37 = vmul.f32 %v4849_v39, %v5249_v18  ;;  %v1934_v7 = vmul.f32 %v4953_v63, %v5249_v18  ;;  %v1937_v47 = vmul.f32 %v4963_v10, %v5249_v18 }
 0xeff   :  { %v4395_v24 = vpack.i.bf16 %v1923_v29, %v1922_v23  ;;  %v4405_v38 = vpack.i.bf16 %v1925_v33, %v1924_v43  ;;  %v1935_v23 = vmul.f32 %v4951_v60, %v5249_v18 }
 0xf00   :  { %4401 = vrot.lane.b32.xlu0 %v4400_v42, %s4559_s7  ;;  %v4410_v36 = vpack.i.bf16 %v1929_v37, %v1928_v41  ;;  %v1930_v42 = vmul.f32 %v4953_v63, %v5251_v21  ;;  %v4430_v43 = vpack.i.bf16 %v1937_v47, %v1936_v35  ;;  %v1933_v41 = vmul.f32 %v4963_v10, %v5251_v21 }
 0xf01   :  { %4396 = vrot.lane.b32.xlu1 %v4395_v24, %s4559_s7  ;;  %v4420_v29 = vpack.i.bf16 %v1935_v23, %v1934_v7  ;;  %v1931_v24 = vmul.f32 %v4951_v60, %v5251_v21 }
 0xf03   :  { %v4415_v33 = vpack.i.bf16 %v1931_v24, %v1930_v42 }
 0xf05   :  { %4406 = vrot.lane.b32.xlu1 %v4405_v38, %s4559_s7  ;;  %v1932_v38 = vmul.f32 %v4965_v11, %v5251_v21 }
 0xf09   :  { %4411 = vrot.lane.b32.xlu1 %v4410_v36, %s4559_s7 }
 0xf72   :  { %v4402_v26 = vpop.permute.xlu0 %4401 }
 0xf73   :  { %v4404_v44 = vunpack.i.h.bf16 %v4402_v26  ;;  %v4403_v62 = vunpack.i.l.bf16 %v4402_v26  ;;  %v4397_v45 = vpop.permute.xlu1 %4396 }
 0xf74   :  { %v4399_v49 = vunpack.i.h.bf16 %v4397_v45  ;;  %v4398_v20 = vunpack.i.l.bf16 %v4397_v45 }
 0xf75   :  { %v4201_v48 = vpack.c.bf16 %v4404_v44, %v4403_v62 }
 0xf76   :  { %v4193_v50 = vpack.c.bf16 %v4399_v49, %v4398_v20 }
 0xf77   :  { %4203 = vmatpush3.bf16.xpose.msk.msra.mxu0 %vm4895_vm15, %v4201_v48  ;;  %v4407_v40 = vpop.permute.xlu1 %4406 }
 0xf78   :  { %4195 = vmatpush3.bf16.xpose.msk.msra.mxu1 %vm4895_vm15, %v4193_v50  ;;  %4204 = vmatprep.subr.bf16.mxu0 %v4558_v34  ;;  %v4409_v39 = vunpack.i.h.bf16 %v4407_v40  ;;  %v4408_v46 = vunpack.i.l.bf16 %v4407_v40 }
 0xf79   :  { %4196 = vmatprep.subr.bf16.mxu1 %v4558_v34 }
 0xf7a   :  { %v4197_v56 = vpack.c.bf16 %v4409_v39, %v4408_v46 }
 0xf7b   :  { %v4412_v16 = vpop.permute.xlu1 %4411 }
 0xf7c   :  { %v4414_v54 = vunpack.i.h.bf16 %v4412_v16  ;;  %v4413_v55 = vunpack.i.l.bf16 %v4412_v16 }
 0xf7e   :  { %v4205_v57 = vpack.c.bf16 %v4414_v54, %v4413_v55 }
 0xf80   :  { %4199 = vmatpush3.bf16.xpose.msk.msra.mxu1 %vm4895_vm15, %v4197_v56  ;;  %4207 = vmatpush3.bf16.xpose.msk.msra.mxu0 %vm4895_vm15, %v4205_v57 }
 0xf81   :  { %4216 = vmatprep.subr.bf16.mxu0 %v4558_v34  ;;  %4209 = vmatprep.subr.msk.bf16.mxu1 %vm4791_vm10, %v4565_v53 }
 0xf87   :  { %3911 = vmatmul.mubr.msk.f32.vlgmr.msra.gmra.mrb[16].mxu1 %vm288_vm0, %v5251_v21  ;;  %3922 = vmatmul.mubr.msk.f32.vlgmr.msra.gmra.mrb[16].mxu0 %vm288_vm0, %v5249_v18  ;;  %v4425_v18 = vpack.i.bf16 %v1933_v41, %v1932_v38 }
 0xf88   :  { %4211 = vmatpush3.bf16.msk.msra.mxu1 %vm4791_vm10, %v4565_v53  ;;  %3943 = vmatprep.mubr.msk.f32.mxu0 %vm4560_vm14, %v4556_v5 }
 0xf89   :  { %4213 = vmatprep.subr.msk.bf16.mxu1 %vm4816_vm13, %v4565_v53 }
 0xf8c   :  { %4215 = vmatpush3.bf16.msk.msra.mxu1 %vm4816_vm13, %v4565_v53 }
 0xf8d   :  { %4222 = vmatprep.subr.bf16.mxu1 %v4558_v34 }
0x105a   :  { %v2027_v3 = vpop.f32.mrb[16].mxu1  ;;  %v2120_v4 = vpop.f32.mrb[16].mxu0 }
0x105b   :  { %v2124_v28 = vsel %vm115_vm4, 1e-10, %v2027_v3  ;;  %v2125_v31 = vsel %vm116_vm5, 1e-10, %v2120_v4  ;;  %v3912_v17 = vpop.f32.mrb[17].mxu1  ;;  %v3923_v1 = vpop.f32.mrb[17].mxu0 }
0x105c   :  { %v2129_v19 = vsel %vm288_vm0, %v2125_v31, -inf  ;;  %v2126_v6 = vsel %vm288_vm0, %v2124_v28, -inf }
0x105d   :  { %2130 = vmax.xlane.f32.xlu1 %v2129_v19  ;;  %2127 = vmax.xlane.f32.xlu0 %v2126_v6 }
0x106e   :  { %4421 = vrot.lane.b32.xlu1 %v4420_v29, %s4564_s2 }
0x1072   :  { %4431 = vrot.lane.b32.xlu1 %v4430_v43, %s4564_s2 }
0x1073   :  { %4416 = vrot.lane.b32.xlu0 %v4415_v33, %s4564_s2 }
0x1077   :  { %4426 = vrot.lane.b32.xlu0 %v4425_v18, %s4564_s2  ;;  %v2532_v18 = vmul.f32 %v4953_v63, %v4988_v58 }
0x10ea   :  { %v2131_v37 = vpop.xlane.xlu1 %2130  ;;  %v2128_v36 = vpop.xlane.xlu0 %2127 }
0x10eb   :  { %v2133_v26 = vsub.f32 %v2125_v31, %v2131_v37  ;;  %v2132_v44 = vsub.f32 %v2124_v28, %v2128_v36  ;;  %v2533_v37 = vmul.f32 %v4951_v60, %v4988_v58 }
0x10ed   :  { %v2136_v62 = vmul.f32 1.442695, %v2133_v26  ;;  %v2134_v45 = vmul.f32 1.442695, %v2132_v44  ;;  %v4435_v36 = vpack.i.bf16 %v2533_v37, %v2532_v18  ;;  %v2538_v44 = vmul.f32 %v4965_v11, %v4836_v30 }
0x10ee   :  { %v4417_v49 = vpop.permute.xlu0 %4416  ;;  %v4422_v50 = vpop.permute.xlu1 %4421 }
0x10ef   :  { %4513 = vpow2.f32 %v2136_v62  ;;  %v4419_v20 = vunpack.i.h.bf16 %v4417_v49  ;;  %v4418_v48 = vunpack.i.l.bf16 %v4417_v49  ;;  %v4424_v54 = vunpack.i.h.bf16 %v4422_v50 }
0x10f0   :  { %4515 = vpow2.f32 %v2134_v45  ;;  %v4423_v55 = vunpack.i.l.bf16 %v4422_v50  ;;  %v2539_v62 = vmul.f32 %v4963_v10, %v4836_v30 }
0x10f1   :  { %v4217_v21 = vpack.c.bf16 %v4419_v20, %v4418_v48 }
0x10f2   :  { %v4427_v40 = vpop.permute.xlu0 %4426  ;;  %v4432_v56 = vpop.permute.xlu1 %4431  ;;  %v4223_v4 = vpack.c.bf16 %v4424_v54, %v4423_v55  ;;  %v4450_v45 = vpack.i.bf16 %v2539_v62, %v2538_v44 }
0x10f3   :  { %v4429_v39 = vunpack.i.h.bf16 %v4427_v40  ;;  %v4428_v46 = vunpack.i.l.bf16 %v4427_v40  ;;  %4218 = vmatpush3.bf16.msra.mxu0 %v4217_v21  ;;  %v4434_v28 = vunpack.i.h.bf16 %v4432_v56  ;;  %v4433_v31 = vunpack.i.l.bf16 %v4432_v56 }
0x10f4   :  { %4219 = vmatprep.subr.bf16.mxu0 %v4558_v34 }
0x10f5   :  { %v4220_v16 = vpack.c.bf16 %v4429_v39, %v4428_v46  ;;  %v4226_v17 = vpack.c.bf16 %v4434_v28, %v4433_v31  ;;  %v2536_v31 = vmul.f32 %v4953_v63, %v4836_v30  ;;  %v3499_v63 = vld [vmem:[%s5557_s6 + $0x38] sm:$0xff] }
0x10f7   :  { %4221 = vmatpush3.bf16.msra.mxu0 %v4220_v16 }
0x10f9   :  { %v4514_v57 = vpop.eup %4513 }
0x10fa   :  { %v4516_v3 = vpop.eup %4515 }
0x10fb   :  { %3932 = vmatprep.mubr.msk.f32.mxu1 %vm288_vm0, %v4516_v3 }
0x10fc   :  { %3933 = vmatmul.mubr.msk.f32.vlgmr.msra.gmra.mrb[18].mxu1 %vm288_vm0, %v4514_v57 }
0x10fd   :  { %4224 = vmatpush3.bf16.msra.mxu1 %v4223_v4  ;;  %3954 = vmatprep.mubr.msk.f32.mxu1 %vm4560_vm14, %v4556_v5 }
0x10fe   :  { %4225 = vmatprep.subr.bf16.mxu1 %v4558_v34 }
0x1101   :  { %4227 = vmatpush3.bf16.msra.mxu1 %v4226_v17  ;;  %v2537_v17 = vmul.f32 %v4951_v60, %v4836_v30  ;;  %v3500_v60 = vld [vmem:[%s5557_s6 + $0x40] sm:$0xff] }
0x1102   :  { %4236 = vmatprep.subr.bf16.mxu1 %v4558_v34 }
0x11cf   :  { %v3934_v1 = vpop.f32.mrb[18].mxu1 }
0x11d0   :  { %4517 = vrcp.f32 %v3934_v1  ;;  %v2210_v19 = vpop.f32.mrb[19].mxu1  ;;  %v4440_v1 = vpack.i.bf16 %v2537_v17, %v2536_v31 }
0x11d1   :  { %4519 = vrcp.f32 %v2210_v19  ;;  %v3497_v19 = vld [vmem:[%s5557_s6 + $0x28] sm:$0xff] }
0x11da   :  { %v4518_v6 = vpop.eup %4517 }
0x11db   :  { %v4520_v7 = vpop.eup %4519  ;;  %v2222_v23 = vmul.f32 %v4518_v6, %v4514_v57  ;;  %v3498_v6 = vld [vmem:[%s5557_s6 + $0x30] sm:$0xff] }
0x11dc   :  { %v2221_v29 = vmul.f32 %v4520_v7, %v4516_v3  ;;  %v4228_v7 = vpack.c.bf16 %v3498_v6, %v3497_v19 }
0x11dd   :  { %3955 = vmatmul.mubr.msk.f32.vlgmr.msra.gmra.mrb[20].mxu1 %vm288_vm0, %v2222_v23  ;;  %v4232_v23 = vpack.c.bf16 %v3500_v60, %v3499_v63 }
0x11de   :  { %3944 = vmatmul.mubr.msk.f32.vlgmr.msra.gmra.mrb[18].mxu0 %vm288_vm0, %v2221_v29  ;;  %3976 = vmatprep.mubr.msk.f32.mxu1 %vm4560_vm14, %v4556_v5 }
0x11df   :  { %4229 = vmatprep.subr.bf16.mxu0 %v4228_v7 }
0x11e0   :  { %4231 = vmatpush3.bf16.msra.mxu0 %v4228_v7 }
0x11e1   :  { %4233 = vmatprep.subr.bf16.mxu0 %v4232_v23 }
0x11e4   :  { %4235 = vmatpush3.bf16.msra.mxu0 %v4232_v23 }
0x11e5   :  { %4244 = vmatprep.subr.bf16.mxu0 %v4558_v34 }
0x12b0   :  { %v2397_v35 = vpop.f32.mrb[20].mxu1 }
0x12b1   :  { %v2402_v47 = vadd.f32 %v2397_v35, %v5238_v15  ;;  %v2308_v42 = vpop.f32.mrb[18].mxu0  ;;  %v3956_v24 = vpop.f32.mrb[21].mxu1  ;;  %v2534_v15 = vmul.f32 %v4965_v11, %v4988_v58 }
0x12b2   :  { %v2401_v43 = vadd.f32 %v2308_v42, %v5236_v13  ;;  %v3945_v33 = vpop.f32.mrb[19].mxu0  ;;  %v2535_v13 = vmul.f32 %v4963_v10, %v4988_v58 }
0x12b3   :  { %v2406_v38 = vsel %vm288_vm0, %v2402_v47, 0.0  ;;  %v5390_v33 = vld [vmem:[%s5559_s8 + $0x8] sm:$0x3f] }
0x12b4   :  { %2407 = vadd.xlane.f32.xlu1 %v2406_v38  ;;  %v2403_v41 = vsel %vm288_vm0, %v2401_v43, 0.0  ;;  %v4445_v26 = vpack.i.bf16 %v2535_v13, %v2534_v15  ;;  %v2432_v38 = vrot.slane %v5390_v33, %v5030_v0  ;;  %v2438_v37 = vrot.slane %v5390_v33, %v1005_v2 }
0x12b5   :  { %2404 = vadd.xlane.f32.xlu0 %v2403_v41 }
0x12c5   :  { %4436 = vrot.lane.b32.xlu1 %v4435_v36, %s4564_s2 }
0x12c9   :  { %4446 = vrot.lane.b32.xlu1 %v4445_v26, %s4564_s2 }
0x12cd   :  { %4451 = vrot.lane.b32.xlu1 %v4450_v45, %s4564_s2 }
0x1341   :  { %v2408_v49 = vpop.xlane.xlu1 %2407 }
0x1342   :  { %v2410_v20 = vmul.f32 0.03125, %v2408_v49  ;;  %v2405_v48 = vpop.xlane.xlu0 %2404 }
0x1343   :  { %v2409_v50 = vmul.f32 0.03125, %v2405_v48 }
0x1344   :  { %v2412_v21 = vsub.f32 %v2402_v47, %v2410_v20 }
0x1345   :  { %v2411_v40 = vsub.f32 %v2401_v43, %v2409_v50  ;;  %v4437_v39 = vpop.permute.xlu1 %4436 }
0x1346   :  { %v4439_v46 = vunpack.i.h.bf16 %v4437_v39  ;;  %v4438_v16 = vunpack.i.l.bf16 %v4437_v39  ;;  %v2414_v10 = vmul.f32 %v2412_v21, %v2412_v21 }
0x1347   :  { %v2413_v54 = vmul.f32 %v2411_v40, %v2411_v40 }
0x1348   :  { %v4237_v55 = vpack.c.bf16 %v4439_v46, %v4438_v16  ;;  %v2418_v4 = vsel %vm288_vm0, %v2414_v10, 0.0 }
0x1349   :  { %v4447_v11 = vpop.permute.xlu1 %4446  ;;  %v2415_v56 = vsel %vm288_vm0, %v2413_v54, 0.0 }
0x134a   :  { %4239 = vmatpush3.bf16.xpose.msk.msra.mxu1 %vm4895_vm15, %v4237_v55  ;;  %2416 = vadd.xlane.f32.xlu0 %v2415_v56  ;;  %v4449_v57 = vunpack.i.h.bf16 %v4447_v11  ;;  %v4448_v3 = vunpack.i.l.bf16 %v4447_v11 }
0x134b   :  { %4240 = vmatprep.subr.bf16.mxu1 %v4558_v34 }
0x134c   :  { %v4241_v28 = vpack.c.bf16 %v4449_v57, %v4448_v3 }
0x134d   :  { %v4452_v48 = vpop.permute.xlu1 %4451 }
0x134e   :  { %2419 = vadd.xlane.f32.xlu0 %v2418_v4  ;;  %v4454_v2 = vunpack.i.h.bf16 %v4452_v48  ;;  %v4453_v50 = vunpack.i.l.bf16 %v4452_v48 }
0x1352   :  { %4243 = vmatpush3.bf16.xpose.msk.msra.mxu1 %vm4895_vm15, %v4241_v28 }
0x1353   :  { %4253 = vmatprep.subr.msk.bf16.mxu1 %vm4791_vm10, %v4565_v53 }
0x1364   :  { %4441 = vrot.lane.b32.xlu0 %v4440_v1, %s4564_s2 }
0x13d7   :  { %v2417_v29 = vpop.xlane.xlu0 %2416 }
0x13d8   :  { %v2421_v35 = vmul.f32 0.03125, %v2417_v29 }
0x13da   :  { %v2423_v47 = vadd.f32 1e-05, %v2421_v35 }
0x13db   :  { %v2420_v42 = vpop.xlane.xlu0 %2419 }
0x13dc   :  { %4521 = vrsqrt.f32 %v2423_v47  ;;  %v2422_v24 = vmul.f32 0.03125, %v2420_v42 }
0x13de   :  { %v2424_v43 = vadd.f32 1e-05, %v2422_v24 }
0x13df   :  { %v4442_v36 = vpop.permute.xlu0 %4441 }
0x13e0   :  { %4523 = vrsqrt.f32 %v2424_v43  ;;  %v4444_v62 = vunpack.i.h.bf16 %v4442_v36  ;;  %v4443_v45 = vunpack.i.l.bf16 %v4442_v36 }
0x13e2   :  { %v4245_v0 = vpack.c.bf16 %v4444_v62, %v4443_v45 }
0x13e6   :  { %v4522_v41 = vpop.eup %4521 }
0x13e7   :  { %v2427_v18 = vmul.f32 %v4522_v41, %v2411_v40  ;;  %v3502_v40 = vld [vmem:[%s5557_s6 + $0x48] ss:$0 sm:$0xff] }
0x13e9   :  { %v2433_v15 = vmul.f32 %v2432_v38, %v2427_v18 }
0x13ea   :  { %v4524_v13 = vpop.eup %4523 }
0x13eb   :  { %v2428_v26 = vmul.f32 %v4524_v13, %v2412_v21  ;;  %v5397_v44 = vadd.f32 %v2438_v37, %v2433_v15  ;;  %v4249_v21 = vpack.c.bf16 %v4454_v2, %v4453_v50 }
0x13ed   :  { %v2434_v49 = vmul.f32 %v2432_v38, %v2428_v26  ;;  %3965 = vmatprep.mubr.msk.f32.mxu0 %vm288_vm0, %v5397_v44 }
0x13ef   :  { %v5401_v20 = vadd.f32 %v2438_v37, %v2434_v49 }
0x13f1   :  { %3966 = vmatmul.mubr.msk.f32.vlgmr.msra.gmra.mrb[20].mxu0 %vm288_vm0, %v5401_v20 }
0x13f2   :  { %4247 = vmatpush3.bf16.xpose.msk.msra.mxu0 %vm4895_vm15, %v4245_v0  ;;  %3987 = vmatprep.mubr.msk.f32.mxu0 %vm4560_vm14, %v4556_v5 }
0x13f3   :  { %4248 = vmatprep.subr.bf16.mxu0 %v4558_v34 }
0x13fa   :  { %4251 = vmatpush3.bf16.xpose.msk.msra.mxu0 %vm4895_vm15, %v4249_v21 }
0x13fb   :  { %4260 = vmatprep.subr.bf16.mxu0 %v4558_v34 }
0x14c4   :  { %v3967_v39 = vpop.f32.mrb[20].mxu0 }
0x14c5   :  { %v2529_v46 = vadd.f32 %v3967_v39, %v3502_v40  ;;  %v2523_v16 = vpop.f32.mrb[21].mxu0 }
0x14c6   :  { %v2524_v54 = vadd.f32 %v3502_v40, %v2523_v16 }
0x14c7   :  { %3988 = vmatmul.mubr.msk.f32.vlgmr.msra.gmra.mrb[22].mxu0 %vm288_vm0, %v2529_v46 }
0x14c8   :  { %3977 = vmatmul.mubr.msk.f32.vlgmr.msra.gmra.mrb[22].mxu1 %vm288_vm0, %v2524_v54  ;;  %4009 = vmatprep.mubr.msk.f32.mxu0 %vm4560_vm14, %v4556_v5 }
0x14c9   :  { %4255 = vmatpush3.bf16.msk.msra.mxu1 %vm4791_vm10, %v4565_v53 }
0x14ca   :  { %4257 = vmatprep.subr.msk.bf16.mxu1 %vm4816_vm13, %v4565_v53 }
0x14cd   :  { %4259 = vmatpush3.bf16.msk.msra.mxu1 %vm4816_vm13, %v4565_v53 }
0x14ce   :  { %4266 = vmatprep.subr.bf16.mxu1 %v4558_v34 }
0x159a   :  { %v2742_v61 = vpop.f32.mrb[22].mxu0 }
0x159b   :  { %v2747_v55 = vsel %vm5106_vm6, 1e-10, %v2742_v61  ;;  %v2649_v11 = vpop.f32.mrb[22].mxu1  ;;  %v3989_v56 = vpop.f32.mrb[23].mxu0 }
0x159c   :  { %v2746_v8 = vsel %vm5112_vm7, 1e-10, %v2649_v11  ;;  %v3978_v10 = vpop.f32.mrb[23].mxu1  ;;  %v2751_v57 = vsel %vm288_vm0, %v2747_v55, -inf }
0x159d   :  { %2752 = vmax.xlane.f32.xlu1 %v2751_v57  ;;  %v2748_v3 = vsel %vm288_vm0, %v2746_v8, -inf }
0x159e   :  { %2749 = vmax.xlane.f32.xlu0 %v2748_v3 }
0x15ae   :  { %4461 = vrot.lane.b32.xlu1 %v4824_v27, %s4559_s7 }
0x15b4   :  { %4456 = vrot.lane.b32.xlu0 %v4802_v12, %s4559_s7 }
0x162a   :  { %v2753_v25 = vpop.xlane.xlu1 %2752 }
0x162b   :  { %v2755_v53 = vsub.f32 %v2747_v55, %v2753_v25  ;;  %v2750_v59 = vpop.xlane.xlu0 %2749 }
0x162c   :  { %v2754_v4 = vsub.f32 %v2746_v8, %v2750_v59 }
0x162d   :  { %v2758_v28 = vmul.f32 1.442695, %v2755_v53 }
0x162e   :  { %v2756_v9 = vmul.f32 1.442695, %v2754_v4  ;;  %v4462_v31 = vpop.permute.xlu1 %4461 }
0x162f   :  { %v4464_v17 = vunpack.i.h.bf16 %v4462_v31  ;;  %v4457_v1 = vpop.permute.xlu0 %4456  ;;  %v4463_v19 = vunpack.i.l.bf16 %v4462_v31 }
0x1630   :  { %4525 = vpow2.f32 %v2756_v9  ;;  %v4459_v6 = vunpack.i.h.bf16 %v4457_v1  ;;  %v4458_v7 = vunpack.i.l.bf16 %v4457_v1  ;;  %v3523_v1 = vld [vmem:[%s5560_s9 + $0x28] sm:$0xff] }
0x1631   :  { %4527 = vpow2.f32 %v2758_v28  ;;  %v2555_v23 = vmul.f32 %v4464_v17, %v4988_v58  ;;  %v2559_v29 = vmul.f32 %v4464_v17, %v4836_v30  ;;  %v2554_v35 = vmul.f32 %v4463_v19, %v4988_v58 }
0x1632   :  { %v2553_v63 = vmul.f32 %v4459_v6, %v4988_v58  ;;  %v2557_v27 = vmul.f32 %v4459_v6, %v4836_v30  ;;  %v2552_v12 = vmul.f32 %v4458_v7, %v4988_v58  ;;  %v2556_v60 = vmul.f32 %v4458_v7, %v4836_v30  ;;  %v3525_v7 = vld [vmem:[%s5560_s9 + $0x38] sm:$0xff] }
0x1633   :  { %v2558_v47 = vmul.f32 %v4463_v19, %v4836_v30  ;;  %v4475_v38 = vpack.i.bf16 %v2555_v23, %v2554_v35  ;;  %v3524_v19 = vld [vmem:[%s5560_s9 + $0x30] sm:$0xff]  ;;  %v3530_v23 = vld [vmem:[%s5561_s10 + $0x58] sm:$0xff]  ;;  %v3531_v35 = vld [vmem:[%s5561_s10 + $0x60] sm:$0xff] }
0x1634   :  { %v4470_v42 = vpack.i.bf16 %v2557_v27, %v2556_v60  ;;  %v4465_v24 = vpack.i.bf16 %v2553_v63, %v2552_v12  ;;  %v4272_v6 = vpack.c.bf16 %v3524_v19, %v3523_v1  ;;  %v3526_v63 = vld [vmem:[%s5560_s9 + $0x40] sm:$0xff]  ;;  %v3528_v12 = vld [vmem:[%s5561_s10 + $0x48] sm:$0xff]  ;;  %v3529_v60 = vld [vmem:[%s5561_s10 + $0x50] sm:$0xff] }
0x1635   :  { %v4480_v43 = vpack.i.bf16 %v2559_v29, %v2558_v47  ;;  %v4276_v27 = vpack.c.bf16 %v3526_v63, %v3525_v7  ;;  %v4280_v29 = vpack.c.bf16 %v3529_v60, %v3528_v12  ;;  %v4284_v47 = vpack.c.bf16 %v3531_v35, %v3530_v23  ;;  %v3291_v1 = vld [vmem:[%s5562_s11] sm:$0xff]  ;;  %v3292_v19 = vld [vmem:[%s5562_s11 + $0x8] sm:$0xff]  ;;  %v3294_v63 = vld [vmem:[%s5562_s11 + $0x18] sm:$0xff] }
0x1636   :  { %4471 = vrot.lane.b32.xlu1 %v4470_v42, %s4557_s27  ;;  %4466 = vrot.lane.b32.xlu0 %v4465_v24, %s4557_s27  ;;  %v3532_v42 = vld [vmem:[%s5561_s10 + $0x68] sm:$0xff]  ;;  %v3533_v24 = vld [vmem:[%s5561_s10 + $0x70] sm:$0xff]  ;;  %v4296_v7 = vpack.c.bf16 %v3292_v19, %v3291_v1 }
0x163a   :  { %v4526_v41 = vpop.eup %4525  ;;  %4481 = vrot.lane.b32.xlu1 %v4480_v43, %s4557_s27  ;;  %4476 = vrot.lane.b32.xlu0 %v4475_v38, %s4557_s27  ;;  %v4288_v43 = vpack.c.bf16 %v3533_v24, %v3532_v42  ;;  %v3282_v42 = vrot.slane %v5390_v33, %v1819_v51  ;;  %v3543_v51 = vld [vmem:[%s5562_s11 + $0x20] ss:$0 sm:$0xff] }
0x163b   :  { %v4528_v18 = vpop.eup %4527  ;;  %3998 = vmatprep.mubr.msk.f32.mxu1 %vm288_vm0, %v4526_v41 }
0x163c   :  { %3999 = vmatmul.mubr.msk.f32.vlgmr.msra.gmra.mrb[24].mxu1 %vm288_vm0, %v4528_v18 }
0x163d   :  { %4020 = vmatprep.mubr.msk.f32.mxu1 %vm4560_vm14, %v4556_v5 }
0x16a8   :  { %v4472_v30 = vpop.permute.xlu1 %4471  ;;  %v4467_v58 = vpop.permute.xlu0 %4466 }
0x16a9   :  { %v4474_v37 = vunpack.i.h.bf16 %v4472_v30  ;;  %v4473_v36 = vunpack.i.l.bf16 %v4472_v30  ;;  %v4469_v15 = vunpack.i.h.bf16 %v4467_v58  ;;  %v4468_v13 = vunpack.i.l.bf16 %v4467_v58 }
0x16ab   :  { %v4267_v26 = vpack.c.bf16 %v4474_v37, %v4473_v36  ;;  %v4261_v62 = vpack.c.bf16 %v4469_v15, %v4468_v13  ;;  %v3054_v36 = vrot.slane %v5390_v33, %v1592_v32  ;;  %v3534_v32 = vld [vmem:[%s5561_s10 + $0x78] sm:$0xff] }
0x16ac   :  { %v4482_v45 = vpop.permute.xlu1 %4481  ;;  %v4477_v49 = vpop.permute.xlu0 %4476 }
0x16ad   :  { %v4484_v0 = vunpack.i.h.bf16 %v4482_v45  ;;  %v4483_v48 = vunpack.i.l.bf16 %v4482_v45  ;;  %v4479_v2 = vunpack.i.h.bf16 %v4477_v49  ;;  %v4478_v50 = vunpack.i.l.bf16 %v4477_v49  ;;  %4262 = vmatpush3.bf16.msra.mxu0 %v4261_v62  ;;  %4268 = vmatpush3.bf16.msra.mxu1 %v4267_v26 }
0x16ae   :  { %4263 = vmatprep.subr.bf16.mxu0 %v4558_v34  ;;  %4269 = vmatprep.subr.bf16.mxu1 %v4558_v34  ;;  %v3060_v26 = vrot.slane %v5390_v33, %v1598_v22  ;;  %v3537_v22 = vld [vmem:[%s5560_s9 + $0x48] ss:$0 sm:$0xff] }
0x16af   :  { %v4270_v5 = vpack.c.bf16 %v4484_v0, %v4483_v48  ;;  %v4264_v21 = vpack.c.bf16 %v4479_v2, %v4478_v50  ;;  %v3535_v50 = vld [vmem:[%s5561_s10 + $0x80] sm:$0xff] }
0x16b1   :  { %4265 = vmatpush3.bf16.msra.mxu0 %v4264_v21  ;;  %4271 = vmatpush3.bf16.msra.mxu1 %v4270_v5  ;;  %v4292_v5 = vpack.c.bf16 %v3535_v50, %v3534_v32 }
0x16b2   :  { %4273 = vmatprep.subr.bf16.mxu0 %v4272_v6  ;;  %4281 = vmatprep.subr.bf16.mxu1 %v4280_v29 }
0x170f   :  { %v4000_v40 = vpop.f32.mrb[24].mxu1 }
0x1710   :  { %4529 = vrcp.f32 %v4000_v40  ;;  %v2832_v39 = vpop.f32.mrb[25].mxu1 }
0x1711   :  { %4531 = vrcp.f32 %v2832_v39 }
0x171a   :  { %v4530_v46 = vpop.eup %4529 }
0x171b   :  { %v4532_v16 = vpop.eup %4531  ;;  %v2844_v54 = vmul.f32 %v4530_v46, %v4528_v18 }
0x171c   :  { %v2843_v61 = vmul.f32 %v4532_v16, %v4526_v41 }
0x171d   :  { %4021 = vmatmul.mubr.msk.f32.vlgmr.msra.gmra.mrb[26].mxu1 %vm288_vm0, %v2844_v54 }
0x171e   :  { %4010 = vmatmul.mubr.msk.f32.vlgmr.msra.gmra.mrb[24].mxu0 %vm288_vm0, %v2843_v61  ;;  %4283 = vmatpush3.bf16.msra.mxu1 %v4280_v29  ;;  %v3540_v61 = vld [vmem:[%s5561_s10 + $0x88] ss:$0 sm:$0xff] }
0x171f   :  { %4275 = vmatpush3.bf16.msra.mxu0 %v4272_v6  ;;  %4285 = vmatprep.subr.bf16.mxu1 %v4284_v47  ;;  %v3293_v6 = vld [vmem:[%s5562_s11 + $0x10] sm:$0xff] }
0x1720   :  { %4277 = vmatprep.subr.bf16.mxu0 %v4276_v27 }
0x1722   :  { %4287 = vmatpush3.bf16.msra.mxu1 %v4284_v47 }
0x1723   :  { %4279 = vmatpush3.bf16.msra.mxu0 %v4276_v27  ;;  %4289 = vmatprep.subr.bf16.mxu1 %v4288_v43  ;;  %v4300_v27 = vpack.c.bf16 %v3294_v63, %v3293_v6 }
0x1724   :  { %4297 = vmatprep.subr.bf16.mxu0 %v4296_v7 }
0x1726   :  { %4291 = vmatpush3.bf16.msra.mxu1 %v4288_v43 }
0x1727   :  { %4293 = vmatprep.subr.bf16.mxu1 %v4292_v5 }
0x172a   :  { %4295 = vmatpush3.bf16.msra.mxu1 %v4292_v5 }
0x17f0   :  { %v3019_v55 = vpop.f32.mrb[26].mxu1 }
0x17f1   :  { %v3024_v11 = vadd.f32 %v3019_v55, %v5401_v20  ;;  %v2930_v34 = vpop.f32.mrb[24].mxu0  ;;  %v4022_v56 = vpop.f32.mrb[27].mxu1 }
0x17f2   :  { %v3023_v8 = vadd.f32 %v2930_v34, %v5397_v44  ;;  %v4011_v10 = vpop.f32.mrb[25].mxu0 }
0x17f3   :  { %v3028_v57 = vsel %vm288_vm0, %v3024_v11, 0.0 }
0x17f4   :  { %3029 = vadd.xlane.f32.xlu1 %v3028_v57  ;;  %v3025_v3 = vsel %vm288_vm0, %v3023_v8, 0.0 }
0x17f5   :  { %3026 = vadd.xlane.f32.xlu0 %v3025_v3 }
0x1881   :  { %v3030_v25 = vpop.xlane.xlu1 %3029 }
0x1882   :  { %v3032_v53 = vmul.f32 0.03125, %v3030_v25  ;;  %v3027_v59 = vpop.xlane.xlu0 %3026 }
0x1883   :  { %v3031_v4 = vmul.f32 0.03125, %v3027_v59 }
0x1884   :  { %v3034_v28 = vsub.f32 %v3024_v11, %v3032_v53 }
0x1885   :  { %v3033_v9 = vsub.f32 %v3023_v8, %v3031_v4 }
0x1886   :  { %v3036_v17 = vmul.f32 %v3034_v28, %v3034_v28 }
0x1887   :  { %v3035_v31 = vmul.f32 %v3033_v9, %v3033_v9 }
0x1888   :  { %v3040_v44 = vsel %vm288_vm0, %v3036_v17, 0.0 }
0x1889   :  { %v3037_v20 = vsel %vm288_vm0, %v3035_v31, 0.0 }
0x188a   :  { %3038 = vadd.xlane.f32.xlu0 %v3037_v20 }
0x188e   :  { %3041 = vadd.xlane.f32.xlu0 %v3040_v44 }
0x1917   :  { %v3039_v38 = vpop.xlane.xlu0 %3038 }
0x1918   :  { %v3043_v41 = vmul.f32 0.03125, %v3039_v38 }
0x191a   :  { %v3045_v18 = vadd.f32 1e-05, %v3043_v41 }
0x191b   :  { %v3042_v30 = vpop.xlane.xlu0 %3041 }
0x191c   :  { %4533 = vrsqrt.f32 %v3045_v18  ;;  %v3044_v58 = vmul.f32 0.03125, %v3042_v30  ;;  %v3288_v18 = vrot.slane %v5390_v33, %v1825_v52 }
0x191e   :  { %v3046_v37 = vadd.f32 1e-05, %v3044_v58 }
0x1920   :  { %4535 = vrsqrt.f32 %v3046_v37 }
0x1926   :  { %v4534_v15 = vpop.eup %4533 }
0x1927   :  { %v3049_v13 = vmul.f32 %v4534_v15, %v3033_v9 }
0x1929   :  { %v3055_v62 = vmul.f32 %v3054_v36, %v3049_v13 }
0x192a   :  { %v4536_v45 = vpop.eup %4535 }
0x192b   :  { %v3050_v49 = vmul.f32 %v4536_v45, %v3034_v28  ;;  %v3061_v0 = vadd.f32 %v3060_v26, %v3055_v62 }
0x192d   :  { %v3056_v48 = vmul.f32 %v3054_v36, %v3050_v49  ;;  %4031 = vmatprep.mubr.msk.f32.mxu0 %vm288_vm0, %v3061_v0 }
0x192f   :  { %v3062_v2 = vadd.f32 %v3060_v26, %v3056_v48 }
0x1931   :  { %4032 = vmatmul.mubr.msk.f32.vlgmr.msra.gmra.mrb[26].mxu0 %vm288_vm0, %v3062_v2 }
0x1932   :  { %4299 = vmatpush3.bf16.msra.mxu0 %v4296_v7 }
0x1933   :  { %4301 = vmatprep.subr.bf16.mxu0 %v4300_v27 }
0x1936   :  { %4303 = vmatpush3.bf16.msra.mxu0 %v4300_v27 }
0x1a04   :  { %v4033_v21 = vpop.f32.mrb[26].mxu0 }
0x1a05   :  { %v3161_v40 = vadd.f32 %v4033_v21, %v3537_v22  ;;  %v3155_v39 = vpop.f32.mrb[27].mxu0 }
0x1a06   :  { %v3156_v46 = vadd.f32 %v3537_v22, %v3155_v39 }
0x1a07   :  { %v3165_v54 = vmax.f32 %v3161_v40, 0.0 }
0x1a08   :  { %v3164_v16 = vmax.f32 %v3156_v46, 0.0 }
0x1a0a   :  { %4050 = vmatprep.mubr.msk.f32.mxu1 %vm1707_vm8, %v3164_v16 }
0x1a0b   :  { %4051 = vmatmul.mubr.msk.f32.vlgmr.msra.gmra.mrb[28].mxu1 %vm1707_vm8, %v3165_v54 }
0x1ade   :  { %v4052_v55 = vpop.f32.mrb[28].mxu1 }
0x1adf   :  { %v3248_v11 = vadd.f32 %v4052_v55, %v3540_v61  ;;  %v3242_v34 = vpop.f32.mrb[29].mxu1 }
0x1ae0   :  { %v3243_v56 = vadd.f32 %v3540_v61, %v3242_v34 }
0x1ae1   :  { %v3252_v8 = vadd.f32 %v3248_v11, %v3062_v2 }
0x1ae2   :  { %v3251_v10 = vadd.f32 %v3243_v56, %v3061_v0 }
0x1ae3   :  { %v3256_v57 = vsel %vm288_vm0, %v3252_v8, 0.0 }
0x1ae4   :  { %3257 = vadd.xlane.f32.xlu0 %v3256_v57  ;;  %v3253_v3 = vsel %vm288_vm0, %v3251_v10, 0.0 }
0x1ae5   :  { %3254 = vadd.xlane.f32.xlu1 %v3253_v3 }
0x1b71   :  { %v3258_v25 = vpop.xlane.xlu0 %3257 }
0x1b72   :  { %v3260_v53 = vmul.f32 0.03125, %v3258_v25  ;;  %v3255_v59 = vpop.xlane.xlu1 %3254 }
0x1b73   :  { %v3259_v4 = vmul.f32 0.03125, %v3255_v59 }
0x1b74   :  { %v3262_v28 = vsub.f32 %v3252_v8, %v3260_v53 }
0x1b75   :  { %v3261_v9 = vsub.f32 %v3251_v10, %v3259_v4 }
0x1b76   :  { %v3264_v31 = vmul.f32 %v3262_v28, %v3262_v28 }
0x1b77   :  { %v3263_v20 = vmul.f32 %v3261_v9, %v3261_v9 }
0x1b78   :  { %v3268_v17 = vsel %vm288_vm0, %v3264_v31, 0.0 }
0x1b79   :  { %3269 = vadd.xlane.f32.xlu0 %v3268_v17  ;;  %v3265_v44 = vsel %vm288_vm0, %v3263_v20, 0.0 }
0x1b7a   :  { %3266 = vadd.xlane.f32.xlu1 %v3265_v44 }
0x1c06   :  { %v3270_v12 = vpop.xlane.xlu0 %3269 }
0x1c07   :  { %v3272_v60 = vmul.f32 0.03125, %v3270_v12  ;;  %v3267_v23 = vpop.xlane.xlu1 %3266 }
0x1c08   :  { %v3271_v29 = vmul.f32 0.03125, %v3267_v23 }
0x1c09   :  { %v3274_v35 = vadd.f32 1e-05, %v3272_v60 }
0x1c0a   :  { %v3273_v47 = vadd.f32 1e-05, %v3271_v29 }
0x1c0b   :  { %4537 = vrsqrt.f32 %v3274_v35 }
0x1c0c   :  { %4539 = vrsqrt.f32 %v3273_v47 }
0x1c15   :  { %v4538_v24 = vpop.eup %4537 }
0x1c16   :  { %v4540_v43 = vpop.eup %4539  ;;  %v3278_v38 = vmul.f32 %v4538_v24, %v3262_v28 }
0x1c17   :  { %v3277_v41 = vmul.f32 %v4540_v43, %v3261_v9 }
0x1c18   :  { %v3284_v30 = vmul.f32 %v3282_v42, %v3278_v38 }
0x1c19   :  { %v3283_v58 = vmul.f32 %v3282_v42, %v3277_v41 }
0x1c1a   :  { %v3290_v36 = vadd.f32 %v3288_v18, %v3284_v30 }
0x1c1b   :  { %v3289_v37 = vadd.f32 %v3288_v18, %v3283_v58 }
0x1c1d   :  { %4061 = vmatprep.mubr.msk.f32.mxu0 %vm288_vm0, %v3289_v37 }
0x1c1e   :  { %4062 = vmatmul.mubr.msk.f32.vlgmr.msra.gmra.mrb[28].mxu0 %vm288_vm0, %v3290_v36 }
0x1cf1   :  { %v4063_v15 = vpop.f32.mrb[28].mxu0 }
0x1cf2   :  { %v3378_v13 = vadd.f32 %v4063_v15, %v3543_v51  ;;  %v3372_v26 = vpop.f32.mrb[29].mxu0 }
0x1cf3   :  { %v3373_v62 = vadd.f32 %v3543_v51, %v3372_v26 }
0x1cf4   :  { %3382 = vst [vmem:[%s5576_s0 + $0x8] sm:$0xff] %v3378_v13 }
0x1cf5   :  { %3381 = vst [vmem:[%s5576_s0] sm:$0xff] %v3373_v62 }
0x1cf6   :  { %3387 = vsyncpa [#allocation3], 1 }

</bundles_post_ra>
